<compile_context>
chip_gen: v7x
topology: tpu7x:2x2x1
jax: 0.10.0
libtpu: 0.0.40
codegen_flags: <defaults>
</compile_context>

<pallas_src>
import jax
import jax.numpy as jnp
from jax import lax
from jax.experimental import pallas as pl
from jax.experimental.pallas import tpu as pltpu

K = 3          # kernel_size
PAD = 1        # get_same_padding(3)


def _make_kernel(BH, H, W, Cin, Cexp, Cout):
    WCin, WCexp, WCout = W * Cin, W * Cexp, W * Cout

    def kernel(x_ref, wbig_ref, wdw_ref, wpw3_ref, bias_ref, rsh_ref, out_ref):
        # ---- expand 1x1 (three W-shifted copies) + shortcut 1x1: one matmul --
        # wbig columns: [left-shifted expand | expand | right-shifted expand |
        #                shortcut], all block-diagonal over W and BN-folded.
        x_bf = x_ref[...].astype(jnp.bfloat16)                       # (BH, WCin)
        pw = jnp.dot(x_bf, wbig_ref[...],
                     preferred_element_type=jnp.float32)             # (BH, 3*WCexp+WCout)
        b1 = bias_ref[0:1, :]
        v0 = jnp.maximum(pw[:, 0:WCexp] + b1, 0.0)          # h1 sampled at w-1
        v1 = jnp.maximum(pw[:, WCexp:2 * WCexp] + b1, 0.0)  # h1 sampled at w
        v2 = jnp.maximum(pw[:, 2 * WCexp:3 * WCexp] + b1, 0.0)  # h1 sampled at w+1
        sc = pw[:, 3 * WCexp:3 * WCexp + WCout]              # shortcut (BH, WCout)
        # (W-boundary garbage in v0/v2 is cancelled by zeroed tap lanes in wdw.)

        # ---- depthwise 3x3 + bn2 + relu ---------------------------------------
        # Per-kh tap combination is pure VPU work on register values; the
        # H-shift (with per-image zero boundary) is a tiny 0/1-matrix matmul.
        def taps(kh):
            t = kh * K
            return (v0 * wdw_ref[t:t + 1, :]
                    + v1 * wdw_ref[t + 1:t + 2, :]
                    + v2 * wdw_ref[t + 2:t + 3, :])          # (BH, WCexp) f32

        acc = taps(1)                                        # kh=1: no row shift
        acc = acc + jnp.dot(rsh_ref[0], taps(0).astype(jnp.bfloat16),
                            preferred_element_type=jnp.float32)   # kh=0: row h-1
        acc = acc + jnp.dot(rsh_ref[1], taps(2).astype(jnp.bfloat16),
                            preferred_element_type=jnp.float32)   # kh=2: row h+1
        h2 = jnp.maximum(acc + bias_ref[1:2, :], 0.0)

        # ---- project 1x1 (bn3 folded) + shortcut + biases ---------------------
        out = jnp.dot(h2.astype(jnp.bfloat16), wpw3_ref[...],
                      preferred_element_type=jnp.float32)    # (BH, WCout)
        out = out + sc + bias_ref[2:3, :WCout]
        out_ref[...] = out.astype(out_ref.dtype)             # full-lane (64,128) store

    return kernel


def pack_params(p, W):
    """One-time packing of the 13 raw parameter tensors (hoisted out of the
    per-forward-call path): BN scales folded, block-diagonal lane-dense
    weights, W-shifted expand copies, boundary masks folded into the taps."""
    Cin, Cexp = p["w1"].shape
    Cout = p["w3"].shape[1]
    eye_w = jnp.eye(W, dtype=jnp.float32)
    s_left = jnp.eye(W, k=1, dtype=jnp.float32)    # picks column w-1
    s_right = jnp.eye(W, k=-1, dtype=jnp.float32)  # picks column w+1
    w1s = p["w1"] * p["s1"][None, :]
    wscs = p["wsc"] * p["ssc"][None, :]
    wbig = jnp.concatenate(
        [jnp.kron(s_left, w1s),        # expand, sampled at w-1   (WCin, WCexp)
         jnp.kron(eye_w, w1s),         # expand, sampled at w     (WCin, WCexp)
         jnp.kron(s_right, w1s),       # expand, sampled at w+1   (WCin, WCexp)
         jnp.kron(eye_w, wscs)],       # shortcut                 (WCin, WCout)
        axis=1).astype(jnp.bfloat16)

    wdw = jnp.tile(p["wd"] * p["s2"][None, :], (1, W))        # (K*K, W*Cexp) f32
    wdw = wdw.at[0::K, :Cexp].set(0.0)        # kw=0 taps: zero at w=0 (pad)
    wdw = wdw.at[K - 1::K, -Cexp:].set(0.0)   # kw=2 taps: zero at w=W-1 (pad)

    wpw3 = jnp.kron(eye_w, p["w3"] * p["s3"][None, :]).astype(jnp.bfloat16)

    bias = jnp.zeros((3, W * Cexp), jnp.float32)
    bias = bias.at[0].set(jnp.tile(p["b1"], W))                       # bn1 bias
    bias = bias.at[1].set(jnp.tile(p["b2"], W))                       # bn2 bias
    bias = bias.at[2, :W * Cout].set(jnp.tile(p["b3"] + p["bsc"], W))  # bn3 + sc-bn
    return dict(wbig=wbig, wdw=wdw, wpw3=wpw3, bias=bias)


def _pick_batch_block(N, H, target_rows):
    """Largest divisor B of N with B*H <= target_rows, keeping >=2 grid steps
    (so a v7x megacore can run both TensorCores)."""
    best = 1
    for b in range(1, N + 1):
        if N % b:
            continue
        if b * H > target_rows:
            continue
        if N // b < 2 and N > 1:
            continue
        best = b
    return best


def mb_inverted_conv(x_nhwc, packed, *, target_rows=128):
    """x_nhwc: (N, H, W, Cin) float32.  packed: output of pack_params.
    Returns (N, H, W, Cout)."""
    N, H, W, Cin = x_nhwc.shape
    WCin = W * Cin
    WCexp = packed["wdw"].shape[1]
    WCout = packed["wpw3"].shape[1]
    Cexp, Cout = WCexp // W, WCout // W

    B = _pick_batch_block(N, H, target_rows)   # e.g. 8 rows*B=128 (v5e), 256 (v6e/v7x)
    BH = B * H

    # Row-shift matrices for the depthwise H direction (constant-folded under jit).
    idx = jnp.arange(BH)
    same_img = (idx[:, None] // H) == (idx[None, :] // H)
    r_up = (idx[None, :] == idx[:, None] - 1) & same_img     # reads row h-1
    r_down = (idx[None, :] == idx[:, None] + 1) & same_img   # reads row h+1
    rshift = jnp.stack([r_up, r_down]).astype(jnp.bfloat16)  # (2, BH, BH)

    x_2d = x_nhwc.reshape(N * H, WCin)                       # lane-dense (free)

    kernel = _make_kernel(BH, H, W, Cin, Cexp, Cout)
    grid_spec = pltpu.PrefetchScalarGridSpec(
        num_scalar_prefetch=0,
        grid=(N // B,),
        in_specs=[
            pl.BlockSpec((BH, WCin), lambda n: (n, 0)),
            pl.BlockSpec((WCin, 3 * WCexp + WCout), lambda n: (0, 0)),
            pl.BlockSpec((K * K, WCexp), lambda n: (0, 0)),
            pl.BlockSpec((WCexp, WCout), lambda n: (0, 0)),
            pl.BlockSpec((3, WCexp), lambda n: (0, 0)),
            pl.BlockSpec((2, BH, BH), lambda n: (0, 0, 0)),
        ],
        out_specs=pl.BlockSpec((BH, WCout), lambda n: (n, 0)),
    )
    out_2d = pl.pallas_call(
        kernel,
        out_shape=jax.ShapeDtypeStruct((N * H, WCout), x_nhwc.dtype),
        grid_spec=grid_spec,
        compiler_params=pltpu.CompilerParams(dimension_semantics=("parallel",)),
    )(x_2d, packed["wbig"], packed["wdw"], packed["wpw3"], packed["bias"], rshift)
    return out_2d.reshape(N, H, W, Cout)


def fold_bn(gamma, beta, mean, var, eps=1e-5):
    scale = gamma / jnp.sqrt(var + eps)
    return scale, beta - mean * scale


def reference(x_nhwc, p):
    """Plain-JAX f32 reference (lax convs) for verification."""
    dn = ("NHWC", "HWIO", "NHWC")
    h = lax.conv_general_dilated(x_nhwc, p["w1"].reshape(1, 1, *p["w1"].shape),
                                 (1, 1), "VALID", dimension_numbers=dn)
    h = jnp.maximum(h * p["s1"] + p["b1"], 0.0)
    wd = p["wd"].reshape(K, K, 1, -1)                        # HWIO, depthwise
    h = lax.conv_general_dilated(h, wd, (1, 1), ((PAD, PAD), (PAD, PAD)),
                                 dimension_numbers=dn,
                                 feature_group_count=wd.shape[-1])
    h = jnp.maximum(h * p["s2"] + p["b2"], 0.0)
    h = lax.conv_general_dilated(h, p["w3"].reshape(1, 1, *p["w3"].shape),
                                 (1, 1), "VALID", dimension_numbers=dn)
    h = h * p["s3"] + p["b3"]
    sc = lax.conv_general_dilated(x_nhwc, p["wsc"].reshape(1, 1, *p["wsc"].shape),
                                  (1, 1), "VALID", dimension_numbers=dn)
    sc = sc * p["ssc"] + p["bsc"]
    return h + sc


if __name__ == "__main__":
    N, Cin, H, W = 8, 4, 16, 16          # small batch, enough for 2 batched grid steps
    Cexp, Cout = 16, 8

    keys = jax.random.split(jax.random.PRNGKey(0), 16)
    x_nchw = jax.random.normal(keys[0], (N, Cin, H, W), jnp.float32)   # PyTorch NCHW
    x_nhwc = jnp.transpose(x_nchw, (0, 2, 3, 1))                       # kernel layout

    def bn_params(k, C):
        k1, k2, k3, k4 = jax.random.split(k, 4)
        gamma = jax.random.uniform(k1, (C,), minval=0.8, maxval=1.2)
        beta = 0.05 * jax.random.normal(k2, (C,))
        mean = 0.1 * jax.random.normal(k3, (C,))
        var = jax.random.uniform(k4, (C,), minval=0.5, maxval=1.5)
        return fold_bn(gamma, beta, mean, var)

    w1 = 0.2 * jax.random.normal(keys[1], (Cin, Cexp), jnp.float32)    # conv1 1x1
    s1, b1 = bn_params(keys[2], Cexp)
    wd = 0.2 * jax.random.normal(keys[3], (K * K, Cexp), jnp.float32)  # depthwise taps
    s2, b2 = bn_params(keys[4], Cexp)
    w3 = 0.2 * jax.random.normal(keys[5], (Cexp, Cout), jnp.float32)   # conv3 1x1
    s3, b3 = bn_params(keys[6], Cout)
    wsc = 0.2 * jax.random.normal(keys[7], (Cin, Cout), jnp.float32)   # shortcut 1x1
    ssc, bsc = bn_params(keys[8], Cout)

    params = dict(w1=w1, s1=s1, b1=b1, wd=wd, s2=s2, b2=b2,
                  w3=w3, s3=s3, b3=b3, wsc=wsc, ssc=ssc, bsc=bsc)

    # One-time weight packing (hoisted out of the per-call path per perf review).
    packed = pack_params(params, W)
    packed = jax.block_until_ready(packed)

    fwd = jax.jit(mb_inverted_conv)
    out = fwd(x_nhwc, packed)
    out = jax.block_until_ready(out)

    ref = reference(x_nhwc, params)
    # bf16 MXU operands (f32 accumulation) per the perf review -> relaxed
    # tolerance against the pure-f32 reference.
    assert jnp.allclose(out, ref, atol=2e-2, rtol=2e-2), \
        f"max abs err {float(jnp.max(jnp.abs(out - ref)))}"
    print("KERNEL_OK")
</pallas_src>

<mosaic_0001>
module attributes {stable_mosaic.version = 11 : i64} {
  func.func @kernel(%arg0: i32, %arg1: memref<64x64xf32, #tpu.memory_space<vmem>>, %arg2: memref<64x896xbf16, #tpu.memory_space<vmem>>, %arg3: memref<9x256xf32, #tpu.memory_space<vmem>>, %arg4: memref<256x128xbf16, #tpu.memory_space<vmem>>, %arg5: memref<3x256xf32, #tpu.memory_space<vmem>>, %arg6: memref<2x64x64xbf16, #tpu.memory_space<vmem>>, %arg7: memref<64x128xf32, #tpu.memory_space<vmem>>) attributes {dimension_semantics = [#tpu.dimension_semantics<parallel>], iteration_bounds = array<i64: 2>, scalar_prefetch = 0 : i64, scratch_operands = 0 : i64, tpu.core_type = #tpu.core_type<tc>, window_params = [{transform_indices = @transform_0, window_bounds = array<i64: 64, 64>}, {pipeline_mode = #tpu.pipeline_mode<synchronous>, transform_indices = @transform_1, window_bounds = array<i64: 64, 896>}, {pipeline_mode = #tpu.pipeline_mode<synchronous>, transform_indices = @transform_2, window_bounds = array<i64: 9, 256>}, {pipeline_mode = #tpu.pipeline_mode<synchronous>, transform_indices = @transform_3, window_bounds = array<i64: 256, 128>}, {pipeline_mode = #tpu.pipeline_mode<synchronous>, transform_indices = @transform_4, window_bounds = array<i64: 3, 256>}, {pipeline_mode = #tpu.pipeline_mode<synchronous>, transform_indices = @transform_5, window_bounds = array<i64: 2, 64, 64>}, {transform_indices = @transform_6, window_bounds = array<i64: 64, 128>}]} {
    %c0 = arith.constant 0 : index
    %c0_0 = arith.constant 0 : index
    %0 = vector.load %arg1[%c0, %c0_0] : memref<64x64xf32, #tpu.memory_space<vmem>>, vector<64x64xf32>
    %1 = arith.truncf %0 : vector<64x64xf32> to vector<64x64xbf16>
    %c0_1 = arith.constant 0 : index
    %c0_2 = arith.constant 0 : index
    %2 = vector.load %arg2[%c0_1, %c0_2] : memref<64x896xbf16, #tpu.memory_space<vmem>>, vector<64x896xbf16>
    %cst = arith.constant dense<0.000000e+00> : vector<64x896xf32>
    %3 = tpu.matmul %1, %2, %cst {dimension_numbers = #tpu.dot_dimension_numbers<[1], [0], [0], [1], [0, 0, 1, 1], [], []>} : vector<64x64xbf16>, vector<64x896xbf16>, vector<64x896xf32> -> vector<64x896xf32>
    %c0_3 = arith.constant 0 : index
    %c0_4 = arith.constant 0 : index
    %4 = vector.load %arg5[%c0_3, %c0_4] : memref<3x256xf32, #tpu.memory_space<vmem>>, vector<1x256xf32>
    %5 = vector.extract_strided_slice %3 {offsets = [0, 0], sizes = [64, 256], strides = [1, 1]} : vector<64x896xf32> to vector<64x256xf32>
    %6 = vector.broadcast %4 : vector<1x256xf32> to vector<64x256xf32>
    %7 = arith.addf %5, %6 : vector<64x256xf32>
    %cst_5 = arith.constant 0.000000e+00 : f32
    %8 = vector.broadcast %cst_5 : f32 to vector<64x256xf32>
    %9 = arith.maximumf %7, %8 : vector<64x256xf32>
    %10 = vector.extract_strided_slice %3 {offsets = [0, 256], sizes = [64, 256], strides = [1, 1]} : vector<64x896xf32> to vector<64x256xf32>
    %11 = vector.broadcast %4 : vector<1x256xf32> to vector<64x256xf32>
    %12 = arith.addf %10, %11 : vector<64x256xf32>
    %cst_6 = arith.constant 0.000000e+00 : f32
    %13 = vector.broadcast %cst_6 : f32 to vector<64x256xf32>
    %14 = arith.maximumf %12, %13 : vector<64x256xf32>
    %15 = vector.extract_strided_slice %3 {offsets = [0, 512], sizes = [64, 256], strides = [1, 1]} : vector<64x896xf32> to vector<64x256xf32>
    %16 = vector.broadcast %4 : vector<1x256xf32> to vector<64x256xf32>
    %17 = arith.addf %15, %16 : vector<64x256xf32>
    %cst_7 = arith.constant 0.000000e+00 : f32
    %18 = vector.broadcast %cst_7 : f32 to vector<64x256xf32>
    %19 = arith.maximumf %17, %18 : vector<64x256xf32>
    %20 = vector.extract_strided_slice %3 {offsets = [0, 768], sizes = [64, 128], strides = [1, 1]} : vector<64x896xf32> to vector<64x128xf32>
    %c3 = arith.constant 3 : index
    %c0_8 = arith.constant 0 : index
    %21 = vector.load %arg3[%c3, %c0_8] : memref<9x256xf32, #tpu.memory_space<vmem>>, vector<1x256xf32>
    %22 = vector.broadcast %21 : vector<1x256xf32> to vector<64x256xf32>
    %23 = arith.mulf %9, %22 : vector<64x256xf32>
    %c4 = arith.constant 4 : index
    %c0_9 = arith.constant 0 : index
    %24 = vector.load %arg3[%c4, %c0_9] : memref<9x256xf32, #tpu.memory_space<vmem>>, vector<1x256xf32>
    %25 = vector.broadcast %24 : vector<1x256xf32> to vector<64x256xf32>
    %26 = arith.mulf %14, %25 : vector<64x256xf32>
    %27 = arith.addf %23, %26 : vector<64x256xf32>
    %c5 = arith.constant 5 : index
    %c0_10 = arith.constant 0 : index
    %28 = vector.load %arg3[%c5, %c0_10] : memref<9x256xf32, #tpu.memory_space<vmem>>, vector<1x256xf32>
    %29 = vector.broadcast %28 : vector<1x256xf32> to vector<64x256xf32>
    %30 = arith.mulf %19, %29 : vector<64x256xf32>
    %31 = arith.addf %27, %30 : vector<64x256xf32>
    %c0_11 = arith.constant 0 : index
    %c0_12 = arith.constant 0 : index
    %c0_13 = arith.constant 0 : index
    %32 = vector.load %arg6[%c0_11, %c0_12, %c0_13] : memref<2x64x64xbf16, #tpu.memory_space<vmem>>, vector<1x64x64xbf16>
    %33 = vector.shape_cast %32 : vector<1x64x64xbf16> to vector<64x64xbf16>
    %c0_14 = arith.constant 0 : index
    %c0_15 = arith.constant 0 : index
    %34 = vector.load %arg3[%c0_14, %c0_15] : memref<9x256xf32, #tpu.memory_space<vmem>>, vector<1x256xf32>
    %35 = vector.broadcast %34 : vector<1x256xf32> to vector<64x256xf32>
    %36 = arith.mulf %9, %35 : vector<64x256xf32>
    %c1 = arith.constant 1 : index
    %c0_16 = arith.constant 0 : index
    %37 = vector.load %arg3[%c1, %c0_16] : memref<9x256xf32, #tpu.memory_space<vmem>>, vector<1x256xf32>
    %38 = vector.broadcast %37 : vector<1x256xf32> to vector<64x256xf32>
    %39 = arith.mulf %14, %38 : vector<64x256xf32>
    %40 = arith.addf %36, %39 : vector<64x256xf32>
    %c2 = arith.constant 2 : index
    %c0_17 = arith.constant 0 : index
    %41 = vector.load %arg3[%c2, %c0_17] : memref<9x256xf32, #tpu.memory_space<vmem>>, vector<1x256xf32>
    %42 = vector.broadcast %41 : vector<1x256xf32> to vector<64x256xf32>
    %43 = arith.mulf %19, %42 : vector<64x256xf32>
    %44 = arith.addf %40, %43 : vector<64x256xf32>
    %45 = arith.truncf %44 : vector<64x256xf32> to vector<64x256xbf16>
    %cst_18 = arith.constant dense<0.000000e+00> : vector<64x256xf32>
    %46 = tpu.matmul %33, %45, %cst_18 {dimension_numbers = #tpu.dot_dimension_numbers<[1], [0], [0], [1], [0, 0, 1, 1], [], []>} : vector<64x64xbf16>, vector<64x256xbf16>, vector<64x256xf32> -> vector<64x256xf32>
    %47 = arith.addf %31, %46 : vector<64x256xf32>
    %c1_19 = arith.constant 1 : index
    %c0_20 = arith.constant 0 : index
    %c0_21 = arith.constant 0 : index
    %48 = vector.load %arg6[%c1_19, %c0_20, %c0_21] : memref<2x64x64xbf16, #tpu.memory_space<vmem>>, vector<1x64x64xbf16>
    %49 = vector.shape_cast %48 : vector<1x64x64xbf16> to vector<64x64xbf16>
    %c6 = arith.constant 6 : index
    %c0_22 = arith.constant 0 : index
    %50 = vector.load %arg3[%c6, %c0_22] : memref<9x256xf32, #tpu.memory_space<vmem>>, vector<1x256xf32>
    %51 = vector.broadcast %50 : vector<1x256xf32> to vector<64x256xf32>
    %52 = arith.mulf %9, %51 : vector<64x256xf32>
    %c7 = arith.constant 7 : index
    %c0_23 = arith.constant 0 : index
    %53 = vector.load %arg3[%c7, %c0_23] : memref<9x256xf32, #tpu.memory_space<vmem>>, vector<1x256xf32>
    %54 = vector.broadcast %53 : vector<1x256xf32> to vector<64x256xf32>
    %55 = arith.mulf %14, %54 : vector<64x256xf32>
    %56 = arith.addf %52, %55 : vector<64x256xf32>
    %c8 = arith.constant 8 : index
    %c0_24 = arith.constant 0 : index
    %57 = vector.load %arg3[%c8, %c0_24] : memref<9x256xf32, #tpu.memory_space<vmem>>, vector<1x256xf32>
    %58 = vector.broadcast %57 : vector<1x256xf32> to vector<64x256xf32>
    %59 = arith.mulf %19, %58 : vector<64x256xf32>
    %60 = arith.addf %56, %59 : vector<64x256xf32>
    %61 = arith.truncf %60 : vector<64x256xf32> to vector<64x256xbf16>
    %cst_25 = arith.constant dense<0.000000e+00> : vector<64x256xf32>
    %62 = tpu.matmul %49, %61, %cst_25 {dimension_numbers = #tpu.dot_dimension_numbers<[1], [0], [0], [1], [0, 0, 1, 1], [], []>} : vector<64x64xbf16>, vector<64x256xbf16>, vector<64x256xf32> -> vector<64x256xf32>
    %63 = arith.addf %47, %62 : vector<64x256xf32>
    %c1_26 = arith.constant 1 : index
    %c0_27 = arith.constant 0 : index
    %64 = vector.load %arg5[%c1_26, %c0_27] : memref<3x256xf32, #tpu.memory_space<vmem>>, vector<1x256xf32>
    %65 = vector.broadcast %64 : vector<1x256xf32> to vector<64x256xf32>
    %66 = arith.addf %63, %65 : vector<64x256xf32>
    %cst_28 = arith.constant 0.000000e+00 : f32
    %67 = vector.broadcast %cst_28 : f32 to vector<64x256xf32>
    %68 = arith.maximumf %66, %67 : vector<64x256xf32>
    %69 = arith.truncf %68 : vector<64x256xf32> to vector<64x256xbf16>
    %c0_29 = arith.constant 0 : index
    %c0_30 = arith.constant 0 : index
    %70 = vector.load %arg4[%c0_29, %c0_30] : memref<256x128xbf16, #tpu.memory_space<vmem>>, vector<256x128xbf16>
    %cst_31 = arith.constant dense<0.000000e+00> : vector<64x128xf32>
    %71 = tpu.matmul %69, %70, %cst_31 {dimension_numbers = #tpu.dot_dimension_numbers<[1], [0], [0], [1], [0, 0, 1, 1], [], []>} : vector<64x256xbf16>, vector<256x128xbf16>, vector<64x128xf32> -> vector<64x128xf32>
    %72 = arith.addf %71, %20 : vector<64x128xf32>
    %c2_32 = arith.constant 2 : index
    %c0_33 = arith.constant 0 : index
    %73 = vector.load %arg5[%c2_32, %c0_33] : memref<3x256xf32, #tpu.memory_space<vmem>>, vector<1x128xf32>
    %74 = vector.broadcast %73 : vector<1x128xf32> to vector<64x128xf32>
    %75 = arith.addf %72, %74 : vector<64x128xf32>
    %c0_34 = arith.constant 0 : index
    %c0_35 = arith.constant 0 : index
    %76 = vector.load %arg7[%c0_34, %c0_35] : memref<64x128xf32, #tpu.memory_space<vmem>>, vector<64x128xf32>
    tpu.vector_store %arg7[%c0_34, %c0_35], %75 {strides = array<i32>} : memref<64x128xf32, #tpu.memory_space<vmem>>, vector<64x128xf32>,
    return
  }
  func.func @transform_0(%arg0: i32) -> (i32, i32) {
    %c0_i32 = arith.constant 0 : i32
    %c0_i32_0 = arith.constant 0 : i32
    return %arg0, %c0_i32 : i32, i32
  }
  func.func @transform_1(%arg0: i32) -> (i32, i32) {
    %c0_i32 = arith.constant 0 : i32
    %c0_i32_0 = arith.constant 0 : i32
    %c0_i32_1 = arith.constant 0 : i32
    return %c0_i32, %c0_i32_0 : i32, i32
  }
  func.func @transform_2(%arg0: i32) -> (i32, i32) {
    %c0_i32 = arith.constant 0 : i32
    %c0_i32_0 = arith.constant 0 : i32
    %c0_i32_1 = arith.constant 0 : i32
    return %c0_i32, %c0_i32_0 : i32, i32
  }
  func.func @transform_3(%arg0: i32) -> (i32, i32) {
    %c0_i32 = arith.constant 0 : i32
    %c0_i32_0 = arith.constant 0 : i32
    %c0_i32_1 = arith.constant 0 : i32
    return %c0_i32, %c0_i32_0 : i32, i32
  }
  func.func @transform_4(%arg0: i32) -> (i32, i32) {
    %c0_i32 = arith.constant 0 : i32
    %c0_i32_0 = arith.constant 0 : i32
    %c0_i32_1 = arith.constant 0 : i32
    return %c0_i32, %c0_i32_0 : i32, i32
  }
  func.func @transform_5(%arg0: i32) -> (i32, i32, i32) {
    %c0_i32 = arith.constant 0 : i32
    %c0_i32_0 = arith.constant 0 : i32
    %c0_i32_1 = arith.constant 0 : i32
    %c0_i32_2 = arith.constant 0 : i32
    return %c0_i32, %c0_i32_0, %c0_i32_1 : i32, i32, i32
  }
  func.func @transform_6(%arg0: i32) -> (i32, i32) {
    %c0_i32 = arith.constant 0 : i32
    %c0_i32_0 = arith.constant 0 : i32
    return %arg0, %c0_i32 : i32, i32
  }
}

</mosaic_0001>

<bundles_post_ra>
// kernel: mb_inverted_conv.1
= control target key start
LH: loop header
LB: loop body
LE: loop exit
PB: predicated region body
PF: predicated region fallthrough
CT: control target
= control target key end

     0   :  { %s2121_s21 = smov 0   ;;  %s3107_s0 = inlined_call_operand.vmem [shape: f32[128,64], index: 0, kind: input, shape index: {}]   ;;  %s3108_s1 = inlined_call_operand.vmem [shape: bf16[64,896], index: 1, kind: input, shape index: {}]   ;;  %s3109_s2 = inlined_call_operand.vmem [shape: f32[9,256], index: 2, kind: input, shape index: {}]   ;;  %s3110_s3 = inlined_call_operand.vmem [shape: bf16[256,128], index: 3, kind: input, shape index: {}]   ;;  %s3111_s4 = inlined_call_operand.vmem [shape: f32[3,256], index: 4, kind: input, shape index: {}]   ;;  %s3112_s5 = inlined_call_operand.vmem [shape: bf16[2,64,64], index: 5, kind: input, shape index: {}]   ;;  %s3113_s6 = inlined_call_operand.vmem [shape: f32[128,128], index: 6, kind: output, shape index: {}]  }
   0x1 LB: > { %s1803_s22 = sadd.s32 4294967295, %s2083_s21   ;;  %p1807_p0 = scmp.ge.s32.totalorder %s2083_s21, 1  ;;  %s2083_s21 = sphi %s2121_s21, %s16_s21  }
   0x2   : > { %p213_p1 = scmp.lt.s32.totalorder %s2083_s21, 3 }
   0x4   : > { %p214_p2 = pnand %p1807_p0, %p213_p1 }
   0x6   : > { %217 = sbr.rel (%p214_p2) target bundleno = 828 (0x33c), region = 44 }
   0xd   : > { %v2013_v0 = vld [vmem:[%s3108_s1 + $0x4] ss:$28 sps:$4 sm:$0xff]   ;;  %s1808_s25 = sshll.u32 %s1803_s22, 3  ;;  %v2015_v1 = vld [vmem:[%s3108_s1 + $0xc] ss:$28 sps:$4 sm:$0xff]   ;;  %v3114_v2 = vmov 0   ;;  %v743_v41 = vlaneseq }
   0xe   : > { %489 = vmatprep.mubr.bf16.mxu0 %v3114_v2  ;;  %562 = vmatprep.mubr.bf16.mxu1 %v3114_v2  ;;  %p244_p3 = scmp.lt.s32.totalorder %s1808_s25, 15  ;;  %v2017_v3 = vld [vmem:[%s3108_s1] ss:$28 sps:$4 sm:$0xff]   ;;  %v2018_v4 = vld [vmem:[%s3108_s1 + $0x8] ss:$28 sps:$4 sm:$0xff]   ;;  %vm444_vm0 = vcmask 523264  }
   0xf   : > { %457 = vmatprep.subr.bf16.mxu0 %v2013_v0  ;;  %530 = vmatprep.subr.bf16.mxu1 %v2015_v1  ;;  %v2019_v5 = vld [vmem:[%s3108_s1 + $0x3c] ss:$28 sps:$4 sm:$0xff]   ;;  %v2021_v6 = vld [vmem:[%s3108_s1 + $0x44] ss:$28 sps:$4 sm:$0xff]   ;;  %v2025_v9 = vld [vmem:[%s3108_s1 + $0x74] ss:$28 sps:$4 sm:$0xff]  }
  0x10   : > { %s3219_s25 = smov (!%p244_p3, %s1808_s25), 15  ;;  %458 = vmatpush1.bf16.msra.mxu0 %v2017_v3  ;;  %531 = vmatpush1.bf16.msra.mxu1 %v2018_v4  ;;  %v2023_v7 = vld [vmem:[%s3108_s1 + $0x38] ss:$28 sps:$4 sm:$0xff]   ;;  %v2024_v8 = vld [vmem:[%s3108_s1 + $0x40] ss:$28 sps:$4 sm:$0xff]   ;;  %v744_v42 = vshrl.u32 %v743_v41, 7 }
  0x11   : > { %459 = vmatprep.subr.bf16.mxu0 %v2019_v5  ;;  %532 = vmatprep.subr.bf16.mxu1 %v2021_v6  ;;  %s1809_s18 = sshll.u32 %s3219_s25, 3  ;;  %v2027_v10 = vld [vmem:[%s3108_s1 + $0x7c] ss:$28 sps:$4 sm:$0xff]   ;;  %v2029_v11 = vld [vmem:[%s3108_s1 + $0x70] ss:$28 sps:$4 sm:$0xff]  }
  0x12   : > { %v2030_v12 = vld [vmem:[%s3108_s1 + $0x78] ss:$28 sps:$4 sm:$0xff]   ;;  %v2031_v13 = vld [vmem:[%s3108_s1 + $0xac] ss:$28 sps:$4 sm:$0xff]   ;;  %s2181_s9 = scalar_lea.vmem %s3107_s0, %s1809_s18  ;;  %v2045_v26 = vld [vmem:[%s3108_s1 + $0x84] ss:$28 sps:$4 sm:$0xff]   ;;  %s3087_s7 = scalar_lea.vmem %s3113_s6, %s1809_s18 }
  0x13   : > { %v2033_v14 = vld [vmem:[%s3108_s1 + $0xb4] ss:$28 sps:$4 sm:$0xff]   ;;  %v2035_v15 = vld [vmem:[%s3108_s1 + $0xa8] ss:$28 sps:$4 sm:$0xff]   ;;  %v259_v24 = vld [vmem:[%s2181_s9 + $0x18] sm:$0xff]  ;;  %v2263_v44 = vsub.s32 0, %v744_v42 }
  0x14   : > { %460 = vmatpush1.bf16.msra.mxu0 %v2023_v7  ;;  %533 = vmatpush1.bf16.msra.mxu1 %v2024_v8  ;;  %v2036_v16 = vld [vmem:[%s3108_s1 + $0xb0] ss:$28 sps:$4 sm:$0xff]   ;;  %v256_v17 = vld [vmem:[%s2181_s9] sm:$0xff]  ;;  %v2048_v29 = vld [vmem:[%s3108_s1 + $0xbc] ss:$28 sps:$4 sm:$0xff]   ;;  %v2265_v45 = vsub.s32 1, %v744_v42 }
  0x15   : > { %461 = vmatprep.subr.bf16.mxu0 %v2025_v9  ;;  %534 = vmatprep.subr.bf16.mxu1 %v2027_v10  ;;  %v257_v18 = vld [vmem:[%s2181_s9 + $0x8] sm:$0xff]  ;;  %v2039_v19 = vld [vmem:[%s3108_s1 + $0x14] ss:$28 sps:$4 sm:$0xff]   ;;  %v2043_v28 = vld [vmem:[%s3108_s1 + $0x80] ss:$28 sps:$4 sm:$0xff]   ;;  %3121 = vst [vmem:[#allocation2_spill] sm:$0xff] %v2263_v44 }
  0x16   : > { %v264_v20 = vpack.c.bf16 %v257_v18, %v256_v17  ;;  %v2037_v21 = vld [vmem:[%s3108_s1 + $0x10] ss:$28 sps:$4 sm:$0xff]   ;;  %v2040_v25 = vld [vmem:[%s3108_s1 + $0x48] ss:$28 sps:$4 sm:$0xff]   ;;  %v2046_v32 = vld [vmem:[%s3108_s1 + $0xb8] ss:$28 sps:$4 sm:$0xff]  }
  0x17   : > { %v2042_v22 = vld [vmem:[%s3108_s1 + $0x4c] ss:$28 sps:$4 sm:$0xff]   ;;  %v258_v23 = vld [vmem:[%s2181_s9 + $0x10] sm:$0xff]  ;;  %v260_v30 = vld [vmem:[%s2181_s9 + $0x20] sm:$0xff]  ;;  %3122 = vst [vmem:[#allocation3_spill] sm:$0xff] %v2265_v45 }
  0x18   : > { %462 = vmatpush1.bf16.msra.mxu0 %v2029_v11  ;;  %535 = vmatpush1.bf16.msra.mxu1 %v2030_v12  ;;  %v265_v27 = vpack.c.bf16 %v259_v24, %v258_v23  ;;  %v261_v31 = vld [vmem:[%s2181_s9 + $0x28] sm:$0xff]  ;;  %v262_v34 = vld [vmem:[%s2181_s9 + $0x30] sm:$0xff]  ;;  %v263_v35 = vld [vmem:[%s2181_s9 + $0x38] sm:$0xff] }
  0x19   : > { %463 = vmatprep.subr.bf16.mxu0 %v2031_v13  ;;  %536 = vmatprep.subr.bf16.mxu1 %v2033_v14  ;;  %v266_v33 = vpack.c.bf16 %v261_v31, %v260_v30  ;;  %v267_v36 = vpack.c.bf16 %v263_v35, %v262_v34  ;;  %v2049_v37 = vld [vmem:[%s3108_s1 + $0x18] ss:$28 sps:$4 sm:$0xff]   ;;  %v2050_v38 = vld [vmem:[%s3108_s1 + $0x50] ss:$28 sps:$4 sm:$0xff]   ;;  %v2051_v39 = vld [vmem:[%s3108_s1 + $0x88] ss:$28 sps:$4 sm:$0xff]  }
  0x1a   : > { %v2052_v40 = vld [vmem:[%s3108_s1 + $0xc0] ss:$28 sps:$4 sm:$0xff]   ;;  %v1877_v48 = vld [vmem:[%s3109_s2 + $0x6] ss:$8 sm:$0x3] }
  0x1b   : > { %v741_v43 = vld [vmem:[%s3111_s4] ss:$4 sm:$0x3]  ;;  %v1856_v46 = vld [vmem:[%s3109_s2 + $0x3] ss:$8 sm:$0x3]  ;;  %v2304_v58 = vrot.slane %v1877_v48, %v2263_v44  ;;  %v2322_v0 = vrot.slane %v1877_v48, %v2265_v45 }
  0x1c   : > { %464 = vmatpush1.bf16.msra.mxu0 %v2035_v15  ;;  %537 = vmatpush1.bf16.msra.mxu1 %v2036_v16  ;;  %v976_v47 = vld [vmem:[%s3109_s2] ss:$8 sm:$0x3]  ;;  %v1857_v49 = vld [vmem:[%s3109_s2 + $0x4] ss:$8 sm:$0x3]  ;;  %v2286_v52 = vrot.slane %v741_v43, %v2263_v44  ;;  %v2289_v53 = vrot.slane %v1856_v46, %v2263_v44  ;;  %v2295_v55 = vrot.slane %v741_v43, %v2265_v45 }
  0x1d   : > { %603 = vmatprep.subr.bf16.mxu0 %v2039_v19  ;;  %1956 = vmatprep.subr.bf16.mxu1 %v2049_v37  ;;  %v1859_v50 = vld [vmem:[%s3109_s2 + $0x1] ss:$8 sm:$0x3]  ;;  %v1878_v51 = vld [vmem:[%s3109_s2 + $0x7] ss:$8 sm:$0x3]  ;;  %v2292_v54 = vrot.slane %v976_v47, %v2263_v44  ;;  %v2307_v59 = vrot.slane %v1857_v49, %v2263_v44  ;;  %v2316_v62 = vrot.slane %v1856_v46, %v2265_v45 }
  0x1e   : > { %v1860_v56 = vld [vmem:[%s3109_s2 + $0x2] ss:$8 sm:$0x3]  ;;  %v1879_v57 = vld [vmem:[%s3109_s2 + $0x10] ss:$8 sm:$0x3]  ;;  %v2310_v60 = vrot.slane %v1859_v50, %v2263_v44  ;;  %v2313_v61 = vrot.slane %v1878_v51, %v2263_v44  ;;  %v2319_v63 = vrot.slane %v976_v47, %v2265_v45  ;;  %v2325_v1 = vrot.slane %v1857_v49, %v2265_v45 }
  0x1f   : > { %1840 = vmatmul.mubr.msk.bf16.vlgmr.msra.gmra.mrb[0].mxu0 %vm444_vm0, %v264_v20  ;;  %1844 = vmatmul.mubr.msk.bf16.vlgmr.msra.gmra.mrb[0].mxu1 %vm444_vm0, %v264_v20  ;;  %v1858_v3 = vld [vmem:[%s3109_s2 + $0x5] ss:$8 sm:$0x3]  ;;  %v2331_v6 = vrot.slane %v1859_v50, %v2265_v45  ;;  %v2334_v7 = vrot.slane %v1878_v51, %v2265_v45  ;;  %v2337_v8 = vrot.slane %v1860_v56, %v2263_v44 }
  0x20   : > { %604 = vmatpush1.bf16.msra.mxu0 %v2037_v21  ;;  %499 = vmatprep.mubr.bf16.mxu0 %v3114_v2  ;;  %v2340_v9 = vrot.slane %v1879_v57, %v2263_v44  ;;  %v2345_v14 = vrot.slane %v1860_v56, %v2265_v45  ;;  %v2348_v15 = vrot.slane %v1879_v57, %v2265_v45 }
  0x21   : > { %572 = vmatprep.mubr.bf16.mxu1 %v3114_v2  ;;  %605 = vmatprep.subr.bf16.mxu0 %v2042_v22  ;;  %v2356_v21 = vrot.slane %v1858_v3, %v2265_v45 }
  0x22   : > { %1957 = vmatpush3.bf16.msra.mxu1 %v2049_v37 }
  0x23   : > { %1958 = vmatprep.subr.bf16.mxu1 %v2050_v38  ;;  %3124 = vst [vmem:[#allocation5_spill] sm:$0xff] %v2356_v21 }
  0x24   : > { %606 = vmatpush1.bf16.msra.mxu0 %v2040_v25 }
  0x25   : > { %607 = vmatprep.subr.bf16.mxu0 %v2045_v26 }
  0x26   : > { %1959 = vmatpush3.bf16.msra.mxu1 %v2050_v38 }
  0x27   : > { %1841 = vmatmul.mubr.msk.bf16.gmra.mrb[4].mxu0 %vm444_vm0, %v265_v27  ;;  %1845 = vmatmul.mubr.msk.bf16.gmra.mrb[4].mxu1 %vm444_vm0, %v265_v27 }
  0x28   : > { %509 = vmatprep.mubr.bf16.mxu0 %v3114_v2  ;;  %582 = vmatprep.mubr.bf16.mxu1 %v3114_v2 }
  0x29   : > { %608 = vmatpush1.bf16.msra.mxu0 %v2043_v28  ;;  %1960 = vmatprep.subr.bf16.mxu1 %v2051_v39 }
  0x2a   : > { %609 = vmatprep.subr.bf16.mxu0 %v2048_v29  ;;  %1961 = vmatpush3.bf16.msra.mxu1 %v2051_v39 }
  0x2b   : > { %1962 = vmatprep.subr.bf16.mxu1 %v2052_v40 }
  0x2d   : > { %610 = vmatpush1.bf16.msra.mxu0 %v2046_v32 }
  0x2e   : > { %1963 = vmatpush3.bf16.msra.mxu1 %v2052_v40 }
  0x2f   : > { %1842 = vmatmul.mubr.msk.bf16.gmra.mrb[8].mxu0 %vm444_vm0, %v266_v33  ;;  %1846 = vmatmul.mubr.msk.bf16.gmra.mrb[8].mxu1 %vm444_vm0, %v266_v33 }
  0x30   : > { %519 = vmatprep.mubr.bf16.mxu0 %v3114_v2  ;;  %592 = vmatprep.mubr.bf16.mxu1 %v3114_v2 }
  0x37   : > { %1843 = vmatmul.mubr.msk.bf16.gmra.mrb[12].mxu0 %vm444_vm0, %v267_v36  ;;  %1847 = vmatmul.mubr.msk.bf16.gmra.mrb[12].mxu1 %vm444_vm0, %v267_v36 }
  0x38   : > { %635 = vmatprep.mubr.bf16.mxu0 %v3114_v2  ;;  %1964 = vmatprep.mubr.msk.bf16.mxu1 %vm444_vm0, %v264_v20 }
  0x3f   : > { %1848 = vmatmul.mubr.msk.bf16.vlgmr.msra.gmra.mrb[16].mxu0 %vm444_vm0, %v264_v20  ;;  %1965 = vmatmul.mubr.msk.bf16.vlgmr.msra.gmra.mrb[16].mxu1 %vm444_vm0, %v265_v27  ;;  %v2353_v20 = vrot.slane %v1858_v3, %v2263_v44 }
  0x40   : > { %645 = vmatprep.mubr.bf16.mxu0 %v3114_v2  ;;  %1968 = vmatprep.mubr.msk.bf16.mxu1 %vm444_vm0, %v266_v33 }
  0x41   : > { %3123 = vst [vmem:[#allocation4_spill] sm:$0xff] %v2353_v20 }
  0x47   : > { %1849 = vmatmul.mubr.msk.bf16.gmra.mrb[20].mxu0 %vm444_vm0, %v265_v27  ;;  %1969 = vmatmul.mubr.msk.bf16.gmra.mrb[20].mxu1 %vm444_vm0, %v267_v36 }
  0x48   : > { %655 = vmatprep.mubr.bf16.mxu0 %v3114_v2  ;;  %1166 = vmatprep.mubr.bf16.mxu1 %v3114_v2 }
  0x4f   : > { %1850 = vmatmul.mubr.msk.bf16.gmra.mrb[24].mxu0 %vm444_vm0, %v266_v33 }
  0x50   : > { %665 = vmatprep.mubr.bf16.mxu0 %v3114_v2 }
  0x57   : > { %1851 = vmatmul.mubr.msk.bf16.gmra.mrb[28].mxu0 %vm444_vm0, %v267_v36 }
  0xf2   : > { %v491_v4 = vpop.f32.mrb[0].mxu0  ;;  %v564_v5 = vpop.f32.mrb[0].mxu1 }
  0xf3   : > { %v753_v10 = vadd.f32 %v2286_v52, %v491_v4  ;;  %v785_v11 = vadd.f32 %v2286_v52, %v564_v5  ;;  %v493_v12 = vpop.f32.mrb[1].mxu0  ;;  %v566_v13 = vpop.f32.mrb[1].mxu1 }
  0xf4   : > { %v754_v16 = vadd.f32 %v2295_v55, %v493_v12  ;;  %v786_v17 = vadd.f32 %v2295_v55, %v566_v13  ;;  %v495_v18 = vpop.f32.mrb[2].mxu0  ;;  %v568_v19 = vpop.f32.mrb[2].mxu1 }
  0xf5   : > { %v769_v22 = vmax.f32 %v753_v10, 0.0  ;;  %v801_v23 = vmax.f32 %v785_v11, 0.0  ;;  %v755_v24 = vadd.f32 %v2286_v52, %v495_v18  ;;  %v787_v25 = vadd.f32 %v2286_v52, %v568_v19  ;;  %v497_v26 = vpop.f32.mrb[3].mxu0  ;;  %v570_v27 = vpop.f32.mrb[3].mxu1 }
  0xf6   : > { %v770_v28 = vmax.f32 %v754_v16, 0.0  ;;  %v802_v29 = vmax.f32 %v786_v17, 0.0  ;;  %v756_v30 = vadd.f32 %v2295_v55, %v497_v26  ;;  %v788_v31 = vadd.f32 %v2295_v55, %v570_v27 }
  0xf7   : > { %v2363_v32 = vmul.f32 %v2289_v53, %v769_v22  ;;  %v988_v33 = vmul.f32 %v2292_v54, %v769_v22  ;;  %v1245_v34 = vmul.f32 %v2304_v58, %v769_v22  ;;  %v2368_v35 = vmul.f32 %v2307_v59, %v801_v23 }
  0xf8   : > { %v1017_v36 = vmul.f32 %v2310_v60, %v801_v23  ;;  %v1274_v37 = vmul.f32 %v2313_v61, %v801_v23  ;;  %v2373_v38 = vmul.f32 %v2316_v62, %v770_v28  ;;  %v989_v39 = vmul.f32 %v2319_v63, %v770_v28 }
  0xf9   : > { %3125 = vst [vmem:[#allocation6_spill] sm:$0xff] %v2363_v32  ;;  %3126 = vst [vmem:[#allocation7_spill] sm:$0xff] %v2368_v35  ;;  %v1246_v40 = vmul.f32 %v2322_v0, %v770_v28  ;;  %v2378_v41 = vmul.f32 %v2325_v1, %v802_v29  ;;  %v1018_v42 = vmul.f32 %v2331_v6, %v802_v29  ;;  %v771_v48 = vmax.f32 %v755_v24, 0.0 }
  0xfa   : > { %3127 = vst [vmem:[#allocation8_spill] sm:$0xff] %v2373_v38  ;;  %v1275_v43 = vmul.f32 %v2334_v7, %v802_v29  ;;  %v2382_v46 = vadd.f32 %v1017_v36, %v988_v33  ;;  %v2384_v47 = vadd.f32 %v1274_v37, %v1245_v34  ;;  %v803_v49 = vmax.f32 %v787_v25, 0.0  ;;  %v501_v50 = vpop.f32.mrb[4].mxu0  ;;  %v574_v51 = vpop.f32.mrb[4].mxu1 }
  0xfb   : > { %3128 = vst [vmem:[#allocation9_spill] sm:$0xff] %v2378_v41  ;;  %v2386_v56 = vadd.f32 %v1018_v42, %v989_v39  ;;  %v772_v3 = vmax.f32 %v756_v30, 0.0  ;;  %v804_v4 = vmax.f32 %v788_v31, 0.0  ;;  %v503_v5 = vpop.f32.mrb[5].mxu0  ;;  %v576_v10 = vpop.f32.mrb[5].mxu1  ;;  %v2391_v11 = vmul.f32 %v2289_v53, %v771_v48 }
  0xfc   : > { %v2388_v57 = vadd.f32 %v1275_v43, %v1246_v40  ;;  %v990_v12 = vmul.f32 %v2292_v54, %v771_v48  ;;  %v1247_v13 = vmul.f32 %v2304_v58, %v771_v48  ;;  %v2396_v16 = vmul.f32 %v2307_v59, %v803_v49  ;;  %v505_v17 = vpop.f32.mrb[6].mxu0  ;;  %v578_v18 = vpop.f32.mrb[6].mxu1 }
  0xfd   : > { %3130 = vst [vmem:[#allocation11_spill] sm:$0xff] %v2391_v11  ;;  %v1019_v19 = vmul.f32 %v2310_v60, %v803_v49  ;;  %v1276_v22 = vmul.f32 %v2313_v61, %v803_v49  ;;  %v2401_v23 = vmul.f32 %v2316_v62, %v772_v3  ;;  %v991_v24 = vmul.f32 %v2319_v63, %v772_v3  ;;  %v507_v25 = vpop.f32.mrb[7].mxu0  ;;  %v580_v26 = vpop.f32.mrb[7].mxu1 }
  0xfe   : > { %3129 = vst [vmem:[#allocation10_spill] sm:$0xff] %v2388_v57  ;;  %3131 = vst [vmem:[#allocation12_spill] sm:$0xff] %v2396_v16  ;;  %v1248_v27 = vmul.f32 %v2322_v0, %v772_v3  ;;  %v2406_v28 = vmul.f32 %v2325_v1, %v804_v4  ;;  %v1020_v29 = vmul.f32 %v2331_v6, %v804_v4 }
  0xff   : > { %3132 = vst [vmem:[#allocation13_spill] sm:$0xff] %v2401_v23  ;;  %v1277_v30 = vmul.f32 %v2334_v7, %v804_v4  ;;  %v2410_v31 = vadd.f32 %v1019_v19, %v990_v12  ;;  %v2412_v33 = vadd.f32 %v1276_v22, %v1247_v13  ;;  %v757_v34 = vadd.f32 %v2286_v52, %v501_v50 }
 0x100   : > { %3133 = vst [vmem:[#allocation14_spill] sm:$0xff] %v2406_v28  ;;  %v789_v36 = vadd.f32 %v2286_v52, %v574_v51  ;;  %v2416_v37 = vadd.f32 %v1020_v29, %v991_v24  ;;  %v758_v40 = vadd.f32 %v2295_v55, %v503_v5  ;;  %v790_v42 = vadd.f32 %v2295_v55, %v576_v10 }
 0x101   : > { %v2418_v39 = vadd.f32 %v1277_v30, %v1248_v27  ;;  %v773_v43 = vmax.f32 %v757_v34, 0.0  ;;  %v759_v49 = vadd.f32 %v2286_v52, %v505_v17  ;;  %v791_v3 = vadd.f32 %v2286_v52, %v578_v18 }
 0x102   : > { %v805_v48 = vmax.f32 %v789_v36, 0.0  ;;  %v774_v4 = vmax.f32 %v758_v40, 0.0  ;;  %v806_v12 = vmax.f32 %v790_v42, 0.0  ;;  %v760_v50 = vadd.f32 %v2295_v55, %v507_v25  ;;  %v511_v13 = vpop.f32.mrb[8].mxu0  ;;  %v584_v19 = vpop.f32.mrb[8].mxu1 }
 0x103   : > { %3134 = vst [vmem:[#allocation15_spill] sm:$0xff] %v2418_v39  ;;  %v792_v51 = vadd.f32 %v2295_v55, %v580_v26  ;;  %v2427_v22 = vmul.f32 %v2289_v53, %v773_v43  ;;  %v992_v5 = vmul.f32 %v2292_v54, %v773_v43  ;;  %v1249_v10 = vmul.f32 %v2304_v58, %v773_v43  ;;  %v513_v17 = vpop.f32.mrb[9].mxu0  ;;  %v586_v18 = vpop.f32.mrb[9].mxu1 }
 0x104   : > { %v2432_v24 = vmul.f32 %v2307_v59, %v805_v48  ;;  %v1021_v27 = vmul.f32 %v2310_v60, %v805_v48  ;;  %v1278_v25 = vmul.f32 %v2313_v61, %v805_v48  ;;  %v2437_v26 = vmul.f32 %v2316_v62, %v774_v4  ;;  %v515_v30 = vpop.f32.mrb[10].mxu0  ;;  %v588_v34 = vpop.f32.mrb[10].mxu1 }
 0x105   : > { %3135 = vst [vmem:[#allocation16_spill] sm:$0xff] %v2427_v22  ;;  %v993_v29 = vmul.f32 %v2319_v63, %v774_v4  ;;  %v1250_v36 = vmul.f32 %v2322_v0, %v774_v4  ;;  %v2442_v40 = vmul.f32 %v2325_v1, %v806_v12  ;;  %v1022_v42 = vmul.f32 %v2331_v6, %v806_v12  ;;  %v517_v2 = vpop.f32.mrb[11].mxu0  ;;  %v590_v45 = vpop.f32.mrb[11].mxu1 }
 0x106   : > { %3136 = vst [vmem:[#allocation17_spill] sm:$0xff] %v2432_v24  ;;  %3137 = vst [vmem:[#allocation18_spill] sm:$0xff] %v2437_v26  ;;  %v1279_v43 = vmul.f32 %v2334_v7, %v806_v12  ;;  %v2446_v44 = vadd.f32 %v1021_v27, %v992_v5  ;;  %v2448_v48 = vadd.f32 %v1278_v25, %v1249_v10  ;;  %v775_v26 = vmax.f32 %v759_v49, 0.0 }
 0x107   : > { %3138 = vst [vmem:[#allocation19_spill] sm:$0xff] %v2442_v40  ;;  %v807_v24 = vmax.f32 %v791_v3, 0.0  ;;  %v2450_v22 = vadd.f32 %v1022_v42, %v993_v29  ;;  %v776_v4 = vmax.f32 %v760_v50, 0.0  ;;  %v808_v23 = vmax.f32 %v792_v51, 0.0 }
 0x108   : > { %v2452_v28 = vadd.f32 %v1279_v43, %v1250_v36  ;;  %v2455_v40 = vmul.f32 %v2289_v53, %v775_v26  ;;  %v994_v16 = vmul.f32 %v2292_v54, %v775_v26  ;;  %v1251_v12 = vmul.f32 %v2304_v58, %v775_v26 }
 0x109   : > { %v2460_v5 = vmul.f32 %v2307_v59, %v807_v24  ;;  %v1023_v10 = vmul.f32 %v2310_v60, %v807_v24  ;;  %v1280_v49 = vmul.f32 %v2313_v61, %v807_v24  ;;  %v2465_v3 = vmul.f32 %v2316_v62, %v776_v4 }
 0x10a   : > { %3139 = vst [vmem:[#allocation20_spill] sm:$0xff] %v2452_v28  ;;  %3140 = vst [vmem:[#allocation21_spill] sm:$0xff] %v2455_v40  ;;  %v995_v50 = vmul.f32 %v2319_v63, %v776_v4  ;;  %v1252_v51 = vmul.f32 %v2322_v0, %v776_v4  ;;  %v2470_v27 = vmul.f32 %v2325_v1, %v808_v23  ;;  %v2474_v29 = vpop.f32.mrb[12].mxu0  ;;  %v2476_v36 = vpop.f32.mrb[12].mxu1 }
 0x10b   : > { %3141 = vst [vmem:[#allocation22_spill] sm:$0xff] %v2460_v5  ;;  %3142 = vst [vmem:[#allocation23_spill] sm:$0xff] %v2465_v3  ;;  %v1024_v25 = vmul.f32 %v2331_v6, %v808_v23  ;;  %v1281_v26 = vmul.f32 %v2334_v7, %v808_v23  ;;  %v2478_v42 = vadd.f32 %v1023_v10, %v994_v16  ;;  %v2484_v4 = vpop.f32.mrb[13].mxu0  ;;  %v2486_v5 = vpop.f32.mrb[13].mxu1 }
 0x10c   : > { %3143 = vst [vmem:[#allocation24_spill] sm:$0xff] %v2470_v27  ;;  %v2480_v24 = vadd.f32 %v1280_v49, %v1251_v12  ;;  %v761_v43 = vadd.f32 %v2286_v52, %v511_v13  ;;  %v793_v3 = vadd.f32 %v2286_v52, %v584_v19  ;;  %v762_v23 = vadd.f32 %v2295_v55, %v513_v17  ;;  %v2494_v16 = vpop.f32.mrb[14].mxu0  ;;  %v2496_v12 = vpop.f32.mrb[14].mxu1 }
 0x10d   : > { %v2488_v27 = vadd.f32 %v1024_v25, %v995_v50  ;;  %v2490_v40 = vadd.f32 %v1281_v26, %v1252_v51  ;;  %v794_v11 = vadd.f32 %v2295_v55, %v586_v18  ;;  %v763_v19 = vadd.f32 %v2286_v52, %v515_v30  ;;  %v2500_v21 = vpop.f32.mrb[15].mxu0  ;;  %v2502_v50 = vpop.f32.mrb[15].mxu1  ;;  %v2061_v26 = vld [vmem:[%s3110_s3 + $0x40] sm:$0xff]  }
 0x10e   : > { %v777_v10 = vmax.f32 %v761_v43, 0.0  ;;  %v809_v13 = vmax.f32 %v793_v3, 0.0  ;;  %v795_v49 = vadd.f32 %v2286_v52, %v588_v34  ;;  %v778_v51 = vmax.f32 %v762_v23, 0.0  ;;  %v2062_v30 = vld [vmem:[%s3110_s3] sm:$0xff]   ;;  %v2063_v34 = vld [vmem:[%s3110_s3 + $0x48] sm:$0xff]   ;;  %1916 = vmatprep.subr.bf16.mxu0 %v2061_v26 }
 0x10f   : > { %3144 = vst [vmem:[#allocation25_spill] sm:$0xff] %v2490_v40  ;;  %v810_v25 = vmax.f32 %v794_v11, 0.0  ;;  %v764_v17 = vadd.f32 %v2295_v55, %v517_v2  ;;  %v796_v18 = vadd.f32 %v2295_v55, %v590_v45  ;;  %1917 = vmatpush3.bf16.msra.mxu0 %v2062_v30  ;;  %v779_v32 = vmax.f32 %v763_v19, 0.0 }
 0x110   : > { %v2516_v3 = vmul.f32 %v2289_v53, %v777_v10  ;;  %v996_v11 = vmul.f32 %v2292_v54, %v777_v10  ;;  %v1253_v2 = vmul.f32 %v2304_v58, %v777_v10  ;;  %v2521_v45 = vmul.f32 %v2307_v59, %v809_v13  ;;  %1918 = vmatprep.subr.bf16.mxu0 %v2063_v34 }
 0x111   : > { %v1025_v43 = vmul.f32 %v2310_v60, %v809_v13  ;;  %v1282_v23 = vmul.f32 %v2313_v61, %v809_v13  ;;  %v2526_v41 = vmul.f32 %v2316_v62, %v778_v51  ;;  %v997_v38 = vmul.f32 %v2319_v63, %v778_v51  ;;  %v2064_v13 = vld [vmem:[%s3110_s3 + $0x8] sm:$0xff]  }
 0x112   : > { %3145 = vst [vmem:[#allocation26_spill] sm:$0xff] %v2516_v3  ;;  %3146 = vst [vmem:[#allocation27_spill] sm:$0xff] %v2521_v45  ;;  %v1254_v20 = vmul.f32 %v2322_v0, %v778_v51  ;;  %v2531_v3 = vmul.f32 %v2325_v1, %v810_v25  ;;  %v1026_v10 = vmul.f32 %v2331_v6, %v810_v25  ;;  %v811_v26 = vmax.f32 %v795_v49, 0.0  ;;  %v2542_v40 = vpop.f32.mrb[16].mxu0  ;;  %v2065_v51 = vld [vmem:[%s3110_s3 + $0x50] sm:$0xff]  }
 0x113   : > { %3147 = vst [vmem:[#allocation28_spill] sm:$0xff] %v2526_v41  ;;  %v1283_v35 = vmul.f32 %v2334_v7, %v810_v25  ;;  %v2538_v45 = vadd.f32 %v1025_v43, %v996_v11  ;;  %v2540_v41 = vadd.f32 %v1282_v23, %v1253_v2  ;;  %v780_v30 = vmax.f32 %v764_v17, 0.0  ;;  %v2551_v39 = vpop.f32.mrb[17].mxu0  ;;  %1919 = vmatpush3.bf16.msra.mxu0 %v2064_v13 }
 0x114   : > { %3148 = vst [vmem:[#allocation29_spill] sm:$0xff] %v2531_v3  ;;  %v2547_v3 = vadd.f32 %v1026_v10, %v997_v38  ;;  %v812_v28 = vmax.f32 %v796_v18, 0.0  ;;  %v2554_v11 = vmul.f32 %v2289_v53, %v779_v32  ;;  %v998_v19 = vmul.f32 %v2292_v54, %v779_v32  ;;  %v2561_v2 = vpop.f32.mrb[18].mxu0  ;;  %1920 = vmatprep.subr.bf16.mxu0 %v2065_v51 }
 0x115   : > { %3149 = vst [vmem:[#allocation30_spill] sm:$0xff] %v2540_v41  ;;  %v2549_v25 = vadd.f32 %v1283_v35, %v1254_v20  ;;  %v1255_v49 = vmul.f32 %v2304_v58, %v779_v32  ;;  %v2559_v34 = vmul.f32 %v2307_v59, %v811_v26  ;;  %v1027_v38 = vmul.f32 %v2310_v60, %v811_v26  ;;  %v2569_v18 = vpop.f32.mrb[19].mxu0  ;;  %v2066_v32 = vld [vmem:[%s3110_s3 + $0x10] sm:$0xff]  }
 0x116   : > { %3150 = vst [vmem:[#allocation31_spill] sm:$0xff] %v2547_v3  ;;  %3152 = vst [vmem:[#allocation33_spill] sm:$0xff] %v2554_v11  ;;  %v1284_v20 = vmul.f32 %v2313_v61, %v811_v26  ;;  %v2566_v35 = vmul.f32 %v2316_v62, %v780_v30  ;;  %v999_v17 = vmul.f32 %v2319_v63, %v780_v30 }
 0x117   : > { %3151 = vst [vmem:[#allocation32_spill] sm:$0xff] %v2549_v25  ;;  %3153 = vst [vmem:[#allocation34_spill] sm:$0xff] %v2559_v34  ;;  %v1256_v43 = vmul.f32 %v2322_v0, %v780_v30  ;;  %v2576_v23 = vmul.f32 %v2325_v1, %v812_v28  ;;  %v1028_v10 = vmul.f32 %v2331_v6, %v812_v28  ;;  %1921 = vmatpush3.bf16.msra.mxu0 %v2066_v32 }
 0x118   : > { %3154 = vst [vmem:[#allocation35_spill] sm:$0xff] %v2566_v35  ;;  %v1285_v26 = vmul.f32 %v2334_v7, %v812_v28  ;;  %v2067_v35 = vld [vmem:[%s3110_s3 + $0x58] sm:$0xff]   ;;  %v2583_v34 = vadd.f32 %v1027_v38, %v998_v19  ;;  %v2585_v13 = vadd.f32 %v1284_v20, %v1255_v49  ;;  %v765_v11 = vadd.f32 %v2286_v52, %v2474_v29 }
 0x119   : > { %3155 = vst [vmem:[#allocation36_spill] sm:$0xff] %v2576_v23  ;;  %v797_v30 = vadd.f32 %v2286_v52, %v2476_v36  ;;  %v2591_v23 = vadd.f32 %v1028_v10, %v999_v17  ;;  %v766_v28 = vadd.f32 %v2295_v55, %v2484_v4  ;;  %v798_v51 = vadd.f32 %v2295_v55, %v2486_v5  ;;  %v2068_v36 = vld [vmem:[%s3110_s3 + $0x18] sm:$0xff]  }
 0x11a   : > { %3156 = vst [vmem:[#allocation37_spill] sm:$0xff] %v2583_v34  ;;  %3157 = vst [vmem:[#allocation38_spill] sm:$0xff] %v2585_v13  ;;  %v2593_v25 = vadd.f32 %v1285_v26, %v1256_v43  ;;  %v781_v19 = vmax.f32 %v765_v11, 0.0  ;;  %v767_v49 = vadd.f32 %v2286_v52, %v2494_v16  ;;  %v799_v29 = vadd.f32 %v2286_v52, %v2496_v12  ;;  %v647_v11 = vpop.f32.mrb[20].mxu0  ;;  %v2069_v16 = vld [vmem:[%s3110_s3 + $0x60] sm:$0xff]  }
 0x11b   : > { %3158 = vst [vmem:[#allocation39_spill] sm:$0xff] %v2591_v23  ;;  %v813_v38 = vmax.f32 %v797_v30, 0.0  ;;  %v782_v20 = vmax.f32 %v766_v28, 0.0  ;;  %v814_v17 = vmax.f32 %v798_v51, 0.0  ;;  %v768_v4 = vadd.f32 %v2295_v55, %v2500_v21  ;;  %1922 = vmatprep.subr.bf16.mxu0 %v2067_v35  ;;  %v649_v21 = vpop.f32.mrb[21].mxu0 }
 0x11c   : > { %3159 = vst [vmem:[#allocation40_spill] sm:$0xff] %v2593_v25  ;;  %v800_v5 = vadd.f32 %v2295_v55, %v2502_v50  ;;  %v2614_v12 = vmul.f32 %v2289_v53, %v781_v19  ;;  %v1000_v32 = vmul.f32 %v2292_v54, %v781_v19  ;;  %v1257_v43 = vmul.f32 %v2304_v58, %v781_v19  ;;  %v651_v28 = vpop.f32.mrb[22].mxu0 }
 0x11d   : > { %v2619_v10 = vmul.f32 %v2307_v59, %v813_v38  ;;  %v1029_v26 = vmul.f32 %v2310_v60, %v813_v38  ;;  %v1286_v50 = vmul.f32 %v2313_v61, %v813_v38  ;;  %v2624_v35 = vmul.f32 %v2316_v62, %v782_v20  ;;  %v653_v25 = vpop.f32.mrb[23].mxu0  ;;  %1923 = vmatpush3.bf16.msra.mxu0 %v2068_v36  ;;  %v2070_v38 = vld [vmem:[%s3110_s3 + $0x20] sm:$0xff]  }
 0x11e   : > { %3160 = vst [vmem:[#allocation41_spill] sm:$0xff] %v2614_v12  ;;  %v1001_v30 = vmul.f32 %v2319_v63, %v782_v20  ;;  %v1258_v51 = vmul.f32 %v2322_v0, %v782_v20  ;;  %v2629_v12 = vmul.f32 %v2325_v1, %v814_v17  ;;  %v1030_v19 = vmul.f32 %v2331_v6, %v814_v17 }
 0x11f   : > { %3161 = vst [vmem:[#allocation42_spill] sm:$0xff] %v2619_v10  ;;  %3162 = vst [vmem:[#allocation43_spill] sm:$0xff] %v2624_v35  ;;  %v1287_v10 = vmul.f32 %v2334_v7, %v814_v17  ;;  %v2636_v57 = vadd.f32 %v1029_v26, %v1000_v32  ;;  %v2638_v35 = vadd.f32 %v1286_v50, %v1257_v43  ;;  %v783_v23 = vmax.f32 %v767_v49, 0.0 }
 0x120   : > { %3163 = vst [vmem:[#allocation44_spill] sm:$0xff] %v2629_v12  ;;  %v815_v3 = vmax.f32 %v799_v29, 0.0  ;;  %1924 = vmatprep.subr.bf16.mxu0 %v2069_v16  ;;  %v2640_v20 = vadd.f32 %v1030_v19, %v1001_v30  ;;  %v784_v13 = vmax.f32 %v768_v4, 0.0  ;;  %v816_v34 = vmax.f32 %v800_v5, 0.0 }
 0x121   : > { %v2642_v12 = vadd.f32 %v1287_v10, %v1258_v51  ;;  %v2645_v17 = vmul.f32 %v2289_v53, %v783_v23  ;;  %v1002_v36 = vmul.f32 %v2292_v54, %v783_v23  ;;  %v1259_v41 = vmul.f32 %v2304_v58, %v783_v23  ;;  %1925 = vmatpush3.bf16.msra.mxu0 %v2070_v38 }
 0x122   : > { %v2650_v32 = vmul.f32 %v2307_v59, %v815_v3  ;;  %v1031_v49 = vmul.f32 %v2310_v60, %v815_v3  ;;  %v1288_v29 = vmul.f32 %v2313_v61, %v815_v3  ;;  %v2655_v16 = vmul.f32 %v2316_v62, %v784_v13  ;;  %v657_v59 = vpop.f32.mrb[24].mxu0 }
 0x123   : > { %3164 = vst [vmem:[#allocation45_spill] sm:$0xff] %v2645_v17  ;;  %v1003_v4 = vmul.f32 %v2319_v63, %v784_v13  ;;  %v1260_v53 = vmul.f32 %v2322_v0, %v784_v13  ;;  %v2660_v5 = vmul.f32 %v2325_v1, %v816_v34  ;;  %v1032_v54 = vmul.f32 %v2331_v6, %v816_v34  ;;  %v659_v63 = vpop.f32.mrb[25].mxu0 }
 0x124   : > { %3165 = vst [vmem:[#allocation46_spill] sm:$0xff] %v2650_v32  ;;  %3166 = vst [vmem:[#allocation47_spill] sm:$0xff] %v2655_v16  ;;  %v1289_v58 = vmul.f32 %v2334_v7, %v816_v34  ;;  %v2664_v23 = vadd.f32 %v1031_v49, %v1002_v36  ;;  %v2666_v60 = vadd.f32 %v1288_v29, %v1259_v41  ;;  %v661_v3 = vpop.f32.mrb[26].mxu0 }
 0x125   : > { %3167 = vst [vmem:[#allocation48_spill] sm:$0xff] %v2660_v5  ;;  %v817_v61 = vadd.f32 %v2286_v52, %v2542_v40  ;;  %v818_v62 = vadd.f32 %v2295_v55, %v2551_v39  ;;  %v2672_v0 = vadd.f32 %v1032_v54, %v1003_v4  ;;  %v819_v6 = vadd.f32 %v2286_v52, %v2561_v2  ;;  %v663_v13 = vpop.f32.mrb[27].mxu0 }
 0x126   : > { %v2674_v1 = vadd.f32 %v1289_v58, %v1260_v53  ;;  %v820_v7 = vadd.f32 %v2295_v55, %v2569_v18  ;;  %v821_v40 = vadd.f32 %v2286_v52, %v647_v11  ;;  %v822_v39 = vadd.f32 %v2295_v55, %v649_v21 }
 0x127   : > { %v2680_v41 = vmax.f32 %v817_v61, 0.0  ;;  %v2682_v34 = vmax.f32 %v818_v62, 0.0  ;;  %v2686_v43 = vmax.f32 %v819_v6, 0.0  ;;  %v823_v26 = vadd.f32 %v2286_v52, %v651_v28 }
 0x128   : > { %v2688_v10 = vmax.f32 %v820_v7, 0.0  ;;  %v824_v2 = vadd.f32 %v2295_v55, %v653_v25  ;;  %v2716_v36 = vmax.f32 %v821_v40, 0.0  ;;  %v2718_v49 = vmax.f32 %v822_v39, 0.0 }
 0x129   : > { %v1062_v18 = vmul.f32 %v2337_v8, %v2680_v41  ;;  %v1319_v50 = vmul.f32 %v2340_v9, %v2680_v41  ;;  %v1063_v11 = vmul.f32 %v2345_v14, %v2682_v34  ;;  %v2700_v21 = vmul.f32 %v2348_v15, %v2682_v34 }
 0x12a   : > { %v1064_v30 = vmul.f32 %v2337_v8, %v2686_v43  ;;  %v1321_v28 = vmul.f32 %v2340_v9, %v2686_v43  ;;  %v1065_v25 = vmul.f32 %v2345_v14, %v2688_v10  ;;  %v2710_v51 = vmul.f32 %v2348_v15, %v2688_v10  ;;  %v667_v58 = vpop.f32.mrb[28].mxu0 }
 0x12b   : > { %v1078_v19 = vadd.f32 %v1062_v18, %v2382_v46  ;;  %v2714_v38 = vadd.f32 %v1319_v50, %v2384_v47  ;;  %v2724_v53 = vmax.f32 %v823_v26, 0.0  ;;  %v2726_v54 = vmax.f32 %v824_v2, 0.0 }
 0x12c   : > { %v1080_v29 = vadd.f32 %v1064_v30, %v2410_v31  ;;  %v2722_v4 = vadd.f32 %v1321_v28, %v2412_v33  ;;  %v1066_v46 = vmul.f32 %v2337_v8, %v2716_v36  ;;  %v1323_v47 = vmul.f32 %v2340_v9, %v2716_v36  ;;  %v669_v33 = vpop.f32.mrb[29].mxu0 }
 0x12d   : > { %3168 = vst [vmem:[#allocation49_spill] sm:$0xff] %v2726_v54  ;;  %v1067_v61 = vmul.f32 %v2345_v14, %v2718_v49  ;;  %v2736_v31 = vmul.f32 %v2348_v15, %v2718_v49  ;;  %v1068_v62 = vmul.f32 %v2337_v8, %v2724_v53  ;;  %v1325_v6 = vmul.f32 %v2340_v9, %v2724_v53  ;;  %v671_v39 = vpop.f32.mrb[30].mxu0 }
 0x12e   : > { %v1069_v7 = vmul.f32 %v2345_v14, %v2726_v54  ;;  %v2746_v40 = vmul.f32 %v2348_v15, %v2726_v54  ;;  %v1082_v26 = vadd.f32 %v1066_v46, %v2446_v44  ;;  %v2750_v2 = vadd.f32 %v1323_v47, %v2448_v48  ;;  %v673_v30 = vpop.f32.mrb[31].mxu0 }
 0x12f   : > { %v1079_v18 = vadd.f32 %v1063_v11, %v2386_v56  ;;  %v1081_v50 = vadd.f32 %v1065_v25, %v2416_v37  ;;  %v1084_v28 = vadd.f32 %v1068_v62, %v2478_v42  ;;  %v2756_v5 = vadd.f32 %v1325_v6, %v2480_v24  ;;  %v3171_v62 = vld [vmem:[#allocation38_spill] sm:$0xff] }
 0x130   : > { %v1094_v16 = vpack.c.bf16 %v1080_v29, %v1078_v19  ;;  %v825_v32 = vadd.f32 %v2286_v52, %v657_v59  ;;  %v826_v54 = vadd.f32 %v2295_v55, %v659_v63  ;;  %v827_v44 = vadd.f32 %v2286_v52, %v661_v3  ;;  %v3169_v29 = vld [vmem:[#allocation30_spill] sm:$0xff] }
 0x131   : > { %v1095_v17 = vpack.c.bf16 %v1081_v50, %v1079_v18  ;;  %v828_v48 = vadd.f32 %v2295_v55, %v663_v13  ;;  %v1083_v56 = vadd.f32 %v1067_v61, %v2450_v22  ;;  %v1085_v37 = vadd.f32 %v1069_v7, %v2488_v27  ;;  %v3170_v61 = vld [vmem:[#allocation37_spill] sm:$0xff]  ;;  %v3172_v50 = vld [vmem:[#allocation31_spill] sm:$0xff] }
 0x132   : > { %v2762_v46 = vmax.f32 %v825_v32, 0.0  ;;  %v1096_v42 = vpack.c.bf16 %v1084_v28, %v1082_v26  ;;  %v2766_v24 = vmax.f32 %v826_v54, 0.0  ;;  %v2768_v11 = vmax.f32 %v827_v44, 0.0  ;;  %v3173_v44 = vld [vmem:[#allocation39_spill] sm:$0xff] }
 0x133   : > { %1134 = vmatprep.subr.bf16.mxu1 %v1095_v17  ;;  %v2770_v59 = vmax.f32 %v828_v48, 0.0  ;;  %v829_v63 = vadd.f32 %v2286_v52, %v667_v58  ;;  %v1097_v22 = vpack.c.bf16 %v1085_v37, %v1083_v56  ;;  %v830_v27 = vadd.f32 %v2295_v55, %v669_v33 }
 0x134   : > { %1135 = vmatpush1.bf16.msra.mxu1 %v1094_v16  ;;  %v1070_v3 = vmul.f32 %v2337_v8, %v2762_v46  ;;  %v1327_v32 = vmul.f32 %v2340_v9, %v2762_v46  ;;  %v1071_v17 = vmul.f32 %v2345_v14, %v2766_v24  ;;  %v1328_v13 = vmul.f32 %v2348_v15, %v2766_v24 }
 0x135   : > { %v1072_v25 = vmul.f32 %v2337_v8, %v2768_v11  ;;  %v1329_v16 = vmul.f32 %v2340_v9, %v2768_v11  ;;  %v1073_v58 = vmul.f32 %v2345_v14, %v2770_v59  ;;  %v1330_v47 = vmul.f32 %v2348_v15, %v2770_v59  ;;  %1136 = vmatprep.subr.bf16.mxu1 %v1097_v22 }
 0x136   : > { %v1086_v19 = vadd.f32 %v1070_v3, %v2538_v45  ;;  %v2788_v54 = vadd.f32 %v1327_v32, %v3169_v29  ;;  %v2798_v7 = vmax.f32 %v829_v63, 0.0  ;;  %v2800_v26 = vmax.f32 %v830_v27, 0.0  ;;  %v3174_v27 = vld [vmem:[#allocation10_spill] sm:$0xff] }
 0x137   : > { %v1088_v33 = vadd.f32 %v1072_v25, %v3170_v61  ;;  %v2796_v6 = vadd.f32 %v1329_v16, %v3171_v62  ;;  %v831_v45 = vadd.f32 %v2286_v52, %v671_v39  ;;  %v832_v18 = vadd.f32 %v2295_v55, %v673_v30 }
 0x138   : > { %1137 = vmatpush1.bf16.msra.mxu1 %v1096_v42  ;;  %v1087_v28 = vadd.f32 %v1071_v17, %v3172_v50  ;;  %v1089_v48 = vadd.f32 %v1073_v58, %v3173_v44  ;;  %v1074_v56 = vmul.f32 %v2337_v8, %v2798_v7  ;;  %v1331_v37 = vmul.f32 %v2340_v9, %v2798_v7  ;;  %v3177_v58 = vld [vmem:[#allocation25_spill] sm:$0xff]  ;;  %v3182_v44 = vld [vmem:[#allocation4_spill] sm:$0xff] }
 0x139   : > { %v1075_v63 = vmul.f32 %v2345_v14, %v2800_v26  ;;  %v1332_v42 = vmul.f32 %v2348_v15, %v2800_v26  ;;  %v2814_v3 = vmax.f32 %v831_v45, 0.0  ;;  %v2816_v52 = vmax.f32 %v832_v18, 0.0  ;;  %v3178_v45 = vld [vmem:[#allocation32_spill] sm:$0xff] }
 0x13a   : > { %v1099_v55 = vpack.c.bf16 %v1089_v48, %v1087_v28  ;;  %v1098_v39 = vpack.c.bf16 %v1088_v33, %v1086_v19  ;;  %v1090_v30 = vadd.f32 %v1074_v56, %v2636_v57  ;;  %v2820_v32 = vadd.f32 %v1331_v37, %v2638_v35  ;;  %v3175_v35 = vld [vmem:[#allocation15_spill] sm:$0xff]  ;;  %v3176_v19 = vld [vmem:[#allocation20_spill] sm:$0xff]  ;;  %v3184_v56 = vld [vmem:[#allocation9_spill] sm:$0xff] }
 0x13b   : > { %v1091_v22 = vadd.f32 %v1075_v63, %v2640_v20  ;;  %v1336_v17 = vadd.f32 %v2700_v21, %v3174_v27  ;;  %v1076_v25 = vmul.f32 %v2337_v8, %v2814_v3  ;;  %v1333_v16 = vmul.f32 %v2340_v9, %v2814_v3  ;;  %v3181_v28 = vld [vmem:[#allocation7_spill] sm:$0xff]  ;;  %v3188_v27 = vld [vmem:[#allocation13_spill] sm:$0xff] }
 0x13c   : > { %v1077_v29 = vmul.f32 %v2345_v14, %v2816_v52  ;;  %v1334_v57 = vmul.f32 %v2348_v15, %v2816_v52  ;;  %1138 = vmatprep.subr.bf16.mxu1 %v1099_v55  ;;  %v1338_v20 = vadd.f32 %v2710_v51, %v3175_v35  ;;  %v1351_v21 = vpack.c.bf16 %v2722_v4, %v2714_v38  ;;  %v3179_v4 = vld [vmem:[#allocation40_spill] sm:$0xff] }
 0x13d   : > { %1139 = vmatpush1.bf16.msra.mxu1 %v1098_v39  ;;  %v1340_v8 = vadd.f32 %v2736_v31, %v3176_v19  ;;  %v1342_v9 = vadd.f32 %v2746_v40, %v3177_v58  ;;  %v1092_v61 = vadd.f32 %v1076_v25, %v2664_v23  ;;  %v2843_v14 = vadd.f32 %v1333_v16, %v2666_v60  ;;  %v3187_v55 = vld [vmem:[#allocation12_spill] sm:$0xff]  ;;  %v3193_v58 = vld [vmem:[#allocation19_spill] sm:$0xff] }
 0x13e   : > { %v1093_v15 = vadd.f32 %v1077_v29, %v2672_v0  ;;  %v1353_v33 = vpack.c.bf16 %v2756_v5, %v2750_v2  ;;  %v1352_v51 = vpack.c.bf16 %v1338_v20, %v1336_v17  ;;  %v1344_v38 = vadd.f32 %v1328_v13, %v3178_v45  ;;  %v3180_v2 = vld [vmem:[#allocation6_spill] sm:$0xff]  ;;  %v3190_v29 = vld [vmem:[#allocation16_spill] sm:$0xff] }
 0x13f   : > { %v1354_v62 = vpack.c.bf16 %v1342_v9, %v1340_v8  ;;  %v1346_v18 = vadd.f32 %v1330_v47, %v3179_v4  ;;  %v1100_v50 = vpack.c.bf16 %v1092_v61, %v1090_v30  ;;  %v1355_v40 = vpack.c.bf16 %v2796_v6, %v2788_v54  ;;  %v2053_v47 = vld [vmem:[%s3112_s5] sm:$0xff]   ;;  %v3197_v4 = vld [vmem:[#allocation24_spill] sm:$0xff]  ;;  %v2056_v54 = vld [vmem:[%s3112_s5 + $0x18] sm:$0xff]  }
 0x140   : > { %v1101_v31 = vpack.c.bf16 %v1093_v15, %v1091_v22  ;;  %v2853_v23 = vadd.f32 %v1332_v42, %v2642_v12  ;;  %v2856_v0 = vadd.f32 %v1334_v57, %v2674_v1  ;;  %v1357_v5 = vpack.c.bf16 %v2843_v14, %v2820_v32  ;;  %v3183_v12 = vld [vmem:[#allocation8_spill] sm:$0xff]  ;;  %v3185_v1 = vld [vmem:[#allocation5_spill] sm:$0xff]  ;;  %v3186_v42 = vld [vmem:[#allocation11_spill] sm:$0xff] }
 0x141   : > { %v1356_v60 = vpack.c.bf16 %v1346_v18, %v1344_v38  ;;  %v907_v13 = vadd.f32 %v3181_v28, %v3180_v2  ;;  %v936_v48 = vmul.f32 %v3182_v44, %v2680_v41  ;;  %v908_v37 = vadd.f32 %v3184_v56, %v3183_v12  ;;  %v3189_v17 = vld [vmem:[#allocation14_spill] sm:$0xff]  ;;  %v3191_v57 = vld [vmem:[#allocation17_spill] sm:$0xff]  ;;  %v3196_v38 = vld [vmem:[#allocation23_spill] sm:$0xff] }
 0x142   : > { %1140 = vmatprep.subr.bf16.mxu1 %v1101_v31  ;;  %v937_v63 = vmul.f32 %v3185_v1, %v2682_v34  ;;  %v909_v39 = vadd.f32 %v3187_v55, %v3186_v42  ;;  %v1358_v30 = vpack.c.bf16 %v2856_v0, %v2853_v23  ;;  %v938_v22 = vmul.f32 %v3182_v44, %v2686_v43  ;;  %v3192_v8 = vld [vmem:[#allocation18_spill] sm:$0xff]  ;;  %v3194_v15 = vld [vmem:[#allocation21_spill] sm:$0xff]  ;;  %v3201_v2 = vld [vmem:[#allocation27_spill] sm:$0xff] }
 0x143   : > { %1141 = vmatpush1.bf16.msra.mxu1 %v1100_v50  ;;  %v910_v25 = vadd.f32 %v3189_v17, %v3188_v27  ;;  %v939_v41 = vmul.f32 %v3185_v1, %v2688_v10  ;;  %v2881_v16 = vadd.f32 %v936_v48, %v907_v13  ;;  %v911_v35 = vadd.f32 %v3191_v57, %v3190_v29  ;;  %v3199_v23 = vld [vmem:[#allocation49_spill] sm:$0xff]  ;;  %v3200_v0 = vld [vmem:[#allocation26_spill] sm:$0xff]  ;;  %v2059_v32 = vld [vmem:[%s3112_s5 + $0x30] sm:$0xff]  }
 0x144   : > { %1391 = vmatprep.subr.bf16.mxu1 %v1352_v51  ;;  %v2883_v34 = vadd.f32 %v937_v63, %v908_v37  ;;  %v940_v20 = vmul.f32 %v3182_v44, %v2716_v36  ;;  %v2889_v19 = vadd.f32 %v938_v22, %v909_v39  ;;  %v912_v9 = vadd.f32 %v3193_v58, %v3192_v8  ;;  %v3195_v51 = vld [vmem:[#allocation22_spill] sm:$0xff]  ;;  %v3203_v48 = vld [vmem:[#allocation29_spill] sm:$0xff]  ;;  %v3207_v39 = vld [vmem:[#allocation36_spill] sm:$0xff] }
 0x145   : > { %v2891_v43 = vadd.f32 %v939_v41, %v910_v25  ;;  %v941_v10 = vmul.f32 %v3185_v1, %v2718_v49  ;;  %v913_v45 = vadd.f32 %v3195_v51, %v3194_v15  ;;  %v942_v36 = vmul.f32 %v3182_v44, %v2724_v53  ;;  %v3204_v37 = vld [vmem:[#allocation33_spill] sm:$0xff]  ;;  %v3205_v63 = vld [vmem:[#allocation34_spill] sm:$0xff]  ;;  %v3214_v51 = vld [vmem:[#allocation47_spill] sm:$0xff] }
 0x146   : > { %1865 = vmatmul.mubr.msk.bf16.vlgmr.msra.gmra.mrb[24].mxu1 %vm444_vm0, %v2053_v47  ;;  %v2898_v61 = vadd.f32 %v940_v20, %v911_v35  ;;  %v914_v18 = vadd.f32 %v3197_v4, %v3196_v38  ;;  %v3198_v31 = vmov 0   ;;  %v943_v49 = vmul.f32 %v3185_v1, %v3199_v23  ;;  %v3202_v47 = vld [vmem:[#allocation28_spill] sm:$0xff]  ;;  %v3208_v25 = vld [vmem:[#allocation41_spill] sm:$0xff]  ;;  %v3209_v41 = vld [vmem:[#allocation42_spill] sm:$0xff] }
 0x147   : > { %1392 = vmatpush1.bf16.msra.mxu1 %v1351_v21  ;;  %1176 = vmatprep.mubr.bf16.mxu1 %v3198_v31  ;;  %v2907_v50 = vadd.f32 %v941_v10, %v912_v9  ;;  %v915_v28 = vadd.f32 %v3201_v2, %v3200_v0  ;;  %v2913_v13 = vadd.f32 %v942_v36, %v913_v45  ;;  %v3210_v35 = vld [vmem:[#allocation43_spill] sm:$0xff]  ;;  %v3211_v20 = vld [vmem:[#allocation44_spill] sm:$0xff]  ;;  %v3212_v10 = vld [vmem:[#allocation45_spill] sm:$0xff] }
 0x148   : > { %1393 = vmatprep.subr.bf16.mxu1 %v1354_v62  ;;  %v944_v53 = vmul.f32 %v3182_v44, %v2762_v46  ;;  %v916_v12 = vadd.f32 %v3203_v48, %v3202_v47  ;;  %v945_v21 = vmul.f32 %v3185_v1, %v2766_v24  ;;  %v2921_v56 = vadd.f32 %v943_v49, %v914_v18  ;;  %v3206_v62 = vld [vmem:[#allocation35_spill] sm:$0xff]  ;;  %v3215_v45 = vld [vmem:[#allocation48_spill] sm:$0xff]  ;;  %v2057_v6 = vld [vmem:[%s3112_s5 + $0x20] sm:$0xff]  }
 0x149   : > { %v917_v42 = vadd.f32 %v3205_v63, %v3204_v37  ;;  %v946_v55 = vmul.f32 %v3182_v44, %v2768_v11  ;;  %v918_v22 = vadd.f32 %v3207_v39, %v3206_v62  ;;  %v2054_v46 = vld [vmem:[%s3112_s5 + $0x8] sm:$0xff]   ;;  %v947_v24 = vmul.f32 %v3185_v1, %v2770_v59  ;;  %v3213_v59 = vld [vmem:[#allocation46_spill] sm:$0xff]  ;;  %v2060_v14 = vld [vmem:[%s3112_s5 + $0x38] sm:$0xff]  }
 0x14a   : > { %v2932_v27 = vadd.f32 %v944_v53, %v915_v28  ;;  %v2934_v17 = vadd.f32 %v945_v21, %v916_v12  ;;  %v919_v29 = vadd.f32 %v3209_v41, %v3208_v25  ;;  %v948_v11 = vmul.f32 %v3182_v44, %v2798_v7  ;;  %v2071_v49 = vld [vmem:[%s3110_s3 + $0x68] sm:$0xff]   ;;  %v2073_v2 = vld [vmem:[%s3110_s3 + $0x70] sm:$0xff]   ;;  %v2075_v53 = vld [vmem:[%s3110_s3 + $0x78] sm:$0xff]  }
 0x14b   : > { %1394 = vmatpush1.bf16.msra.mxu1 %v1353_v33  ;;  %v2940_v57 = vadd.f32 %v946_v55, %v917_v42  ;;  %v920_v8 = vadd.f32 %v3211_v20, %v3210_v35  ;;  %v949_v58 = vmul.f32 %v3185_v1, %v2800_v26  ;;  %v2948_v9 = vadd.f32 %v947_v24, %v918_v22  ;;  %v2072_v0 = vld [vmem:[%s3110_s3 + $0x28] sm:$0xff]   ;;  %v2074_v28 = vld [vmem:[%s3110_s3 + $0x30] sm:$0xff]   ;;  %v2076_v47 = vld [vmem:[%s3110_s3 + $0x38] sm:$0xff]  }
 0x14c   : > { %1395 = vmatprep.subr.bf16.mxu1 %v1356_v60  ;;  %v921_v15 = vadd.f32 %v3213_v59, %v3212_v10  ;;  %v950_v33 = vmul.f32 %v3182_v44, %v2814_v3  ;;  %v922_v36 = vadd.f32 %v3215_v45, %v3214_v51  ;;  %v2956_v38 = vadd.f32 %v948_v11, %v919_v29  ;;  %v2055_v60 = vld [vmem:[%s3112_s5 + $0x10] sm:$0xff]   ;;  %v1888_v48 = vld [vmem:[%s3111_s4 + $0x1] ss:$4 sm:$0x3]  ;;  %v3217_v63 = vld [vmem:[#allocation3_spill] sm:$0xff] }
 0x14d   : > { %v2958_v7 = vadd.f32 %v949_v58, %v920_v8  ;;  %v951_v4 = vmul.f32 %v3185_v1, %v2816_v52  ;;  %v2058_v52 = vld [vmem:[%s3112_s5 + $0x28] sm:$0xff]   ;;  %1926 = vmatprep.subr.bf16.mxu0 %v2071_v49  ;;  %v3216_v12 = vld [vmem:[#allocation2_spill] sm:$0xff]  ;;  %v3044_v42 = vrot.slane %v1888_v48, %v3217_v63 }
 0x14e   : > { %1866 = vmatmul.mubr.msk.bf16.gmra.mrb[28].mxu1 %vm444_vm0, %v2054_v46  ;;  %v2963_v26 = vadd.f32 %v950_v33, %v921_v15  ;;  %1927 = vmatpush3.bf16.msra.mxu0 %v2072_v0  ;;  %v3041_v21 = vrot.slane %v1888_v48, %v3216_v12 }
 0x14f   : > { %1396 = vmatpush1.bf16.msra.mxu1 %v1355_v40  ;;  %1186 = vmatprep.mubr.bf16.mxu1 %v3198_v31  ;;  %v2969_v3 = vadd.f32 %v951_v4, %v922_v36  ;;  %v3003_v40 = vpop.f32.mrb[16].mxu1 }
 0x150   : > { %1397 = vmatprep.subr.bf16.mxu1 %v1358_v30  ;;  %1928 = vmatprep.subr.bf16.mxu0 %v2073_v2 }
 0x152   : > { %1929 = vmatpush3.bf16.msra.mxu0 %v2074_v28 }
 0x153   : > { %1398 = vmatpush1.bf16.msra.mxu1 %v1357_v5  ;;  %v3005_v5 = vpop.f32.mrb[17].mxu1  ;;  %1930 = vmatprep.subr.bf16.mxu0 %v2075_v53 }
 0x154   : > { %v3007_v44 = vpop.f32.mrb[18].mxu1 }
 0x155   : > { %v3009_v1 = vpop.f32.mrb[19].mxu1 }
 0x156   : > { %1867 = vmatmul.mubr.msk.bf16.gmra.mrb[32].mxu1 %vm444_vm0, %v2055_v60  ;;  %v3011_v30 = vpop.f32.mrb[20].mxu1  ;;  %1931 = vmatpush3.bf16.msra.mxu0 %v2076_v47 }
 0x157   : > { %1196 = vmatprep.mubr.bf16.mxu1 %v3198_v31  ;;  %v3013_v18 = vpop.f32.mrb[21].mxu1 }
 0x158   : > { %v3015_v23 = vpop.f32.mrb[22].mxu1 }
 0x15e   : > { %1868 = vmatmul.mubr.msk.bf16.gmra.mrb[36].mxu1 %vm444_vm0, %v2056_v54 }
 0x15f   : > { %1423 = vmatprep.mubr.bf16.mxu1 %v3198_v31 }
 0x166   : > { %1884 = vmatmul.mubr.msk.bf16.vlgmr.msra.gmra.mrb[24].mxu1 %vm444_vm0, %v2057_v6 }
 0x167   : > { %1433 = vmatprep.mubr.bf16.mxu1 %v3198_v31 }
 0x16e   : > { %1885 = vmatmul.mubr.msk.bf16.gmra.mrb[28].mxu1 %vm444_vm0, %v2058_v52 }
 0x16f   : > { %1443 = vmatprep.mubr.bf16.mxu1 %v3198_v31 }
 0x176   : > { %1886 = vmatmul.mubr.msk.bf16.gmra.mrb[32].mxu1 %vm444_vm0, %v2059_v32 }
 0x177   : > { %1453 = vmatprep.mubr.bf16.mxu1 %v3198_v31  ;;  %v3017_v31 = vpop.f32.mrb[23].mxu1 }
 0x17e   : > { %1887 = vmatmul.mubr.msk.bf16.gmra.mrb[36].mxu1 %vm444_vm0, %v2060_v14 }
 0x239   : > { %v1425_v37 = vpop.f32.mrb[24].mxu1 }
 0x23a   : > { %v1972_v55 = vadd.f32 %v1425_v37, %v2881_v16  ;;  %v1427_v62 = vpop.f32.mrb[25].mxu1 }
 0x23b   : > { %v1973_v39 = vadd.f32 %v1427_v62, %v2883_v34  ;;  %v1429_v22 = vpop.f32.mrb[26].mxu1 }
 0x23c   : > { %v1493_v46 = vadd.f32 %v1972_v55, %v3041_v21  ;;  %v1974_v24 = vadd.f32 %v1429_v22, %v2889_v19  ;;  %v1431_v25 = vpop.f32.mrb[27].mxu1 }
 0x23d   : > { %v1494_v41 = vadd.f32 %v1973_v39, %v3044_v42  ;;  %v1975_v29 = vadd.f32 %v1431_v25, %v2891_v43 }
 0x23e   : > { %v1495_v11 = vadd.f32 %v1974_v24, %v3041_v21  ;;  %v1509_v20 = vmax.f32 %v1493_v46, 0.0 }
 0x23f   : > { %v1496_v35 = vadd.f32 %v1975_v29, %v3044_v42  ;;  %v1510_v16 = vmax.f32 %v1494_v41, 0.0 }
 0x240   : > { %v1511_v8 = vmax.f32 %v1495_v11, 0.0 }
 0x241   : > { %v1512_v58 = vmax.f32 %v1496_v35, 0.0  ;;  %v1435_v10 = vpop.f32.mrb[28].mxu1 }
 0x242   : > { %v1525_v34 = vpack.c.bf16 %v1511_v8, %v1509_v20  ;;  %v1976_v59 = vadd.f32 %v1435_v10, %v2898_v61  ;;  %v1437_v15 = vpop.f32.mrb[29].mxu1 }
 0x243   : > { %v1977_v19 = vadd.f32 %v1437_v15, %v2907_v50  ;;  %v1439_v33 = vpop.f32.mrb[30].mxu1  ;;  %v1526_v51 = vpack.c.bf16 %v1512_v58, %v1510_v16 }
 0x244   : > { %v1497_v45 = vadd.f32 %v1976_v59, %v3041_v21  ;;  %v1978_v43 = vadd.f32 %v1439_v33, %v2913_v13  ;;  %v1441_v36 = vpop.f32.mrb[31].mxu1 }
 0x245   : > { %v1498_v4 = vadd.f32 %v1977_v19, %v3044_v42  ;;  %v1979_v60 = vadd.f32 %v1441_v36, %v2921_v56  ;;  %1693 = vmatprep.mubr.bf16.mxu0 %v1526_v51 }
 0x246   : > { %v1499_v54 = vadd.f32 %v1978_v43, %v3041_v21  ;;  %1694 = vmatmul.mubr.bf16.vlgmr.msra.gmra.mrb[32].mxu0 %v1525_v34  ;;  %v1513_v6 = vmax.f32 %v1497_v45, 0.0 }
 0x247   : > { %v1500_v61 = vadd.f32 %v1979_v60, %v3044_v42  ;;  %v1514_v50 = vmax.f32 %v1498_v4, 0.0 }
 0x248   : > { %v1515_v52 = vmax.f32 %v1499_v54, 0.0 }
 0x249   : > { %v1516_v32 = vmax.f32 %v1500_v61, 0.0  ;;  %v1445_v14 = vpop.f32.mrb[32].mxu1 }
 0x24a   : > { %v1980_v49 = vadd.f32 %v1445_v14, %v2932_v27  ;;  %v1447_v0 = vpop.f32.mrb[33].mxu1  ;;  %v1527_v13 = vpack.c.bf16 %v1515_v52, %v1513_v6 }
 0x24b   : > { %v1981_v2 = vadd.f32 %v1447_v0, %v2934_v17  ;;  %v1449_v28 = vpop.f32.mrb[34].mxu1  ;;  %v1528_v53 = vpack.c.bf16 %v1516_v32, %v1514_v50 }
 0x24c   : > { %v1501_v56 = vadd.f32 %v1980_v49, %v3041_v21  ;;  %v1982_v47 = vadd.f32 %v1449_v28, %v2940_v57  ;;  %v1451_v48 = vpop.f32.mrb[35].mxu1 }
 0x24d   : > { %v1502_v12 = vadd.f32 %v1981_v2, %v3044_v42  ;;  %v1983_v37 = vadd.f32 %v1451_v48, %v2948_v9  ;;  %1701 = vmatprep.mubr.bf16.mxu0 %v1528_v53 }
 0x24e   : > { %v1503_v63 = vadd.f32 %v1982_v47, %v3041_v21  ;;  %1702 = vmatmul.mubr.bf16.gmra.mrb[36].mxu0 %v1527_v13  ;;  %v1517_v55 = vmax.f32 %v1501_v56, 0.0 }
 0x24f   : > { %v1504_v27 = vadd.f32 %v1983_v37, %v3044_v42  ;;  %v1518_v17 = vmax.f32 %v1502_v12, 0.0 }
 0x250   : > { %v1519_v62 = vmax.f32 %v1503_v63, 0.0 }
 0x251   : > { %v1520_v39 = vmax.f32 %v1504_v27, 0.0  ;;  %v1455_v22 = vpop.f32.mrb[36].mxu1 }
 0x252   : > { %v1984_v46 = vadd.f32 %v1455_v22, %v2956_v38  ;;  %v1457_v24 = vpop.f32.mrb[37].mxu1  ;;  %v1529_v57 = vpack.c.bf16 %v1519_v62, %v1517_v55 }
 0x253   : > { %v1985_v25 = vadd.f32 %v1457_v24, %v2958_v7  ;;  %v1459_v41 = vpop.f32.mrb[38].mxu1  ;;  %v1530_v29 = vpack.c.bf16 %v1520_v39, %v1518_v17 }
 0x254   : > { %v1505_v9 = vadd.f32 %v1984_v46, %v3041_v21  ;;  %v1986_v11 = vadd.f32 %v1459_v41, %v2963_v26  ;;  %v1461_v35 = vpop.f32.mrb[39].mxu1 }
 0x255   : > { %v1506_v20 = vadd.f32 %v1985_v25, %v3044_v42  ;;  %v1987_v8 = vadd.f32 %v1461_v35, %v2969_v3  ;;  %1709 = vmatprep.mubr.bf16.mxu0 %v1530_v29  ;;  %v1905_v3 = vld [vmem:[%s3111_s4 + $0x2] ss:$0 sm:$0xff] }
 0x256   : > { %v1507_v16 = vadd.f32 %v1986_v11, %v3041_v21  ;;  %1710 = vmatmul.mubr.bf16.gmra.mrb[40].mxu0 %v1529_v57  ;;  %v1521_v58 = vmax.f32 %v1505_v9, 0.0 }
 0x257   : > { %v1508_v38 = vadd.f32 %v1987_v8, %v3044_v42  ;;  %v1522_v10 = vmax.f32 %v1506_v20, 0.0 }
 0x258   : > { %v1523_v7 = vmax.f32 %v1507_v16, 0.0 }
 0x259   : > { %v1524_v34 = vmax.f32 %v1508_v38, 0.0 }
 0x25a   : > { %v1531_v59 = vpack.c.bf16 %v1523_v7, %v1521_v58 }
 0x25b   : > { %v1532_v15 = vpack.c.bf16 %v1524_v34, %v1522_v10 }
 0x25d   : > { %1717 = vmatprep.mubr.bf16.mxu0 %v1532_v15 }
 0x25e   : > { %1718 = vmatmul.mubr.bf16.gmra.mrb[44].mxu0 %v1531_v59 }
 0x319   : > { %v1932_v26 = vpop.f32.mrb[32].mxu0 }
 0x31a   : > { %v1933_v19 = vpop.f32.mrb[33].mxu0 }
 0x31b   : > { %v1934_v33 = vadd.f32 %v1933_v19, %v1932_v26  ;;  %v1935_v51 = vpop.f32.mrb[34].mxu0 }
 0x31c   : > { %v1936_v21 = vpop.f32.mrb[35].mxu0 }
 0x31d   : > { %v1696_v42 = vadd.f32 %v1934_v33, %v3005_v5  ;;  %v1937_v45 = vadd.f32 %v1936_v21, %v1935_v51 }
 0x31f   : > { %v1731_v43 = vadd.f32 %v1905_v3, %v1696_v42  ;;  %v1699_v36 = vadd.f32 %v1937_v45, %v3009_v1 }
 0x321   : > { %1739 = vst [vmem:[%s3087_s7] sm:$0xff] %v1731_v43  ;;  %v1732_v4 = vadd.f32 %v1905_v3, %v1699_v36  ;;  %v1938_v60 = vpop.f32.mrb[36].mxu0 }
 0x322   : > { %v1939_v54 = vpop.f32.mrb[37].mxu0 }
 0x323   : > { %1740 = vst [vmem:[%s3087_s7 + $0x8] sm:$0xff] %v1732_v4  ;;  %v1940_v5 = vadd.f32 %v1939_v54, %v1938_v60  ;;  %v1941_v61 = vpop.f32.mrb[38].mxu0 }
 0x324   : > { %v1942_v6 = vpop.f32.mrb[39].mxu0 }
 0x325   : > { %v1704_v52 = vadd.f32 %v3003_v40, %v1940_v5  ;;  %v1943_v50 = vadd.f32 %v1942_v6, %v1941_v61 }
 0x327   : > { %v1733_v32 = vadd.f32 %v1905_v3, %v1704_v52  ;;  %v1707_v14 = vadd.f32 %v3007_v44, %v1943_v50 }
 0x329   : > { %1741 = vst [vmem:[%s3087_s7 + $0x10] sm:$0xff] %v1733_v32  ;;  %v1734_v49 = vadd.f32 %v1905_v3, %v1707_v14  ;;  %v1944_v1 = vpop.f32.mrb[40].mxu0 }
 0x32a   : > { %v1945_v0 = vpop.f32.mrb[41].mxu0 }
 0x32b   : > { %1742 = vst [vmem:[%s3087_s7 + $0x18] sm:$0xff] %v1734_v49  ;;  %v1946_v13 = vadd.f32 %v1945_v0, %v1944_v1  ;;  %v1947_v2 = vpop.f32.mrb[42].mxu0 }
 0x32c   : > { %v1948_v28 = vpop.f32.mrb[43].mxu0 }
 0x32d   : > { %v1712_v53 = vadd.f32 %v1946_v13, %v3013_v18  ;;  %v1949_v56 = vadd.f32 %v1948_v28, %v1947_v2 }
 0x32f   : > { %v1735_v47 = vadd.f32 %v1905_v3, %v1712_v53  ;;  %v1715_v40 = vadd.f32 %v1949_v56, %v3017_v31 }
 0x331   : > { %1743 = vst [vmem:[%s3087_s7 + $0x20] sm:$0xff] %v1735_v47  ;;  %v1736_v48 = vadd.f32 %v1905_v3, %v1715_v40  ;;  %v1950_v44 = vpop.f32.mrb[44].mxu0 }
 0x332   : > { %v1951_v12 = vpop.f32.mrb[45].mxu0 }
 0x333   : > { %1744 = vst [vmem:[%s3087_s7 + $0x28] sm:$0xff] %v1736_v48  ;;  %v1952_v37 = vadd.f32 %v1951_v12, %v1950_v44  ;;  %v1953_v63 = vpop.f32.mrb[46].mxu0 }
 0x334   : > { %v1954_v27 = vpop.f32.mrb[47].mxu0 }
 0x335   : > { %v1720_v55 = vadd.f32 %v3011_v30, %v1952_v37  ;;  %v1955_v62 = vadd.f32 %v1954_v27, %v1953_v63 }
 0x337   : > { %v1737_v17 = vadd.f32 %v1905_v3, %v1720_v55  ;;  %v1723_v18 = vadd.f32 %v3015_v23, %v1955_v62 }
 0x339   : > { %1745 = vst [vmem:[%s3087_s7 + $0x30] sm:$0xff] %v1737_v17  ;;  %v1738_v39 = vadd.f32 %v1905_v3, %v1723_v18 }
 0x33b   : > { %1746 = vst [vmem:[%s3087_s7 + $0x38] sm:$0xff] %v1738_v39 }
 0x33c PF: > { %s16_s21 = sadd.s32 1, %s2083_s21  }
 0x33d   : > { %p13_p4 = scmp.ge.s32.totalorder %s16_s21, 4  }
 0x33f   :  { %15 = sbr.rel (!%p13_p4) target bundleno = 1 (0x1), region = 84 }

</bundles_post_ra>
